<compile_context>
chip_gen: v6e
topology: v6e:2x2x1
jax: 0.10.0
libtpu: 0.0.40
codegen_flags: <defaults>
</compile_context>

<pallas_src>
import numpy as np
import jax
import jax.numpy as jnp
from jax import lax
from jax.experimental import pallas as pl
from jax.experimental.pallas import tpu as pltpu

IN_CH = 128     # module default in_channel
OUT_CH = 64
EPS = 1e-3
NUM_TAPS = 9    # 3x3 window


def _downsample_kernel(win_ref, mask_ref, w1_ref, w2_ref, b_ref, out_ref):
    # win_ref : (TM, 9*Cin) bf16  zero-padded 3x3/s2/p1 taps, tap-major lanes
    # mask_ref: (TM, 9)     f32   0 inside image, -1e30 on padded taps
    # w1_ref  : (Cin, 128)  bf16  path-1 1x1 conv * BN scale, lanes [0,64) live
    # w2_ref  : (9*Cin,128) bf16  path-2 1x1*dw3x3*BN scale, lanes [64,128) live
    # b_ref   : (1, 128)    f32   concat(BN bias path1, path2)
    mask = mask_ref[...]

    # ---- Path 1: MaxPool(3x3, s2, p1) over the 9 taps (f32 VPU math) -------
    pooled = win_ref[:, 0:IN_CH].astype(jnp.float32) + mask[:, 0:1]
    for k in range(1, NUM_TAPS):
        tap = win_ref[:, k * IN_CH:(k + 1) * IN_CH].astype(jnp.float32)
        pooled = jnp.maximum(pooled, tap + mask[:, k:k + 1])

    # ---- Both conv paths as two full-lane-width MXU calls -------------------
    acc = jnp.dot(pooled.astype(jnp.bfloat16), w1_ref[...],
                  preferred_element_type=jnp.float32)          # path 1 -> lanes [0,64)
    acc = acc + jnp.dot(win_ref[...], w2_ref[...],
                        preferred_element_type=jnp.float32)    # path 2 -> lanes [64,128)

    # ---- BN bias + ReLU epilogue, single unmasked 128-lane store ------------
    out_ref[...] = jnp.maximum(acc + b_ref[...], 0.0).astype(out_ref.dtype)


def _choose_block_rows(total_rows, target):
    """Largest multiple-of-8 divisor of total_rows <= target; keep grid >= 2."""
    best = None
    cand = 8
    while cand <= min(target, total_rows):
        if total_rows % cand == 0:
            best = cand
        cand += 8
    if best is None:
        return total_rows                      # full-extent block is always legal
    if best == total_rows and total_rows % 16 == 0:
        best = total_rows // 2                 # >= 2 parallel steps (v7x: 2 TCs)
    return best


def downsample(x_nchw, folded_params, *, target_block_rows=256):
    w1_pad, w2_pad, bias = folded_params
    N, Cin, H, W = x_nchw.shape
    assert Cin == IN_CH, Cin
    Ho = (H + 2 - 3) // 2 + 1
    Wo = (W + 2 - 3) // 2 + 1
    P = Ho * Wo
    rows = N * P

    # NHWC, bf16 activations (MXU-native; halves HBM traffic of the windows).
    x_nhwc = jnp.transpose(x_nchw, (0, 2, 3, 1)).astype(jnp.bfloat16)
    xp = jnp.pad(x_nhwc, ((0, 0), (1, 1), (1, 1), (0, 0)))      # zero pad

    # im2col: 3x3 / stride-2 / pad-1 taps -> (rows, 9*Cin), tap-major lanes.
    taps = []
    for di in range(3):
        for dj in range(3):
            taps.append(xp[:, di:di + 2 * Ho:2, dj:dj + 2 * Wo:2, :])
    win = jnp.stack(taps, axis=3).reshape(rows, NUM_TAPS * IN_CH)

    # Additive border mask for the max-pool path (0 valid, -1e30 on padding).
    oh = jnp.arange(Ho)
    ow = jnp.arange(Wo)
    d = jnp.arange(3)
    row_ok = (2 * oh[:, None] + d[None, :] >= 1) & (2 * oh[:, None] + d[None, :] <= H)
    col_ok = (2 * ow[:, None] + d[None, :] >= 1) & (2 * ow[:, None] + d[None, :] <= W)
    valid = row_ok[:, None, :, None] & col_ok[None, :, None, :]         # (Ho,Wo,3,3)
    mask = jnp.where(valid, 0.0, -1e30).astype(jnp.float32).reshape(1, P, NUM_TAPS)
    mask = jnp.broadcast_to(mask, (N, P, NUM_TAPS)).reshape(rows, NUM_TAPS)

    tm = _choose_block_rows(rows, target_block_rows)
    grid = (rows // tm,)

    out = pl.pallas_call(
        _downsample_kernel,
        out_shape=jax.ShapeDtypeStruct((rows, 2 * OUT_CH), jnp.float32),
        grid=grid,
        in_specs=[
            pl.BlockSpec((tm, NUM_TAPS * IN_CH), lambda i: (i, 0)),
            pl.BlockSpec((tm, NUM_TAPS), lambda i: (i, 0)),
            pl.BlockSpec((IN_CH, 2 * OUT_CH), lambda i: (0, 0)),
            pl.BlockSpec((NUM_TAPS * IN_CH, 2 * OUT_CH), lambda i: (0, 0)),
            pl.BlockSpec((1, 2 * OUT_CH), lambda i: (0, 0)),
        ],
        out_specs=pl.BlockSpec((tm, 2 * OUT_CH), lambda i: (i, 0)),
        compiler_params=pltpu.CompilerParams(
            dimension_semantics=("parallel",),
            vmem_limit_bytes=32 * 1024 * 1024),
    )(win, mask, w1_pad, w2_pad, bias)

    out = out.reshape(N, Ho, Wo, 2 * OUT_CH)
    return jnp.transpose(out, (0, 3, 1, 2))                     # back to NCHW


def init_params(key):
    """Raw (PyTorch-style) parameters, eval-mode BN (running stats 0 / 1)."""
    k1, k2, k3, k4, k5, k6, k7 = jax.random.split(key, 7)

    def xavier(k, fan_in, fan_out, shape):
        bound = (6.0 / (fan_in + fan_out)) ** 0.5
        return jax.random.uniform(k, shape, jnp.float32, -bound, bound)

    # path_1[1]: Conv2d(128, 64, 1x1, bias=False) stored as (Cin, Cout)
    w1 = xavier(k1, IN_CH, OUT_CH, (IN_CH, OUT_CH))
    # path_2[0]: Conv2d(128, 64, 1x1, bias=False) stored as (Cin, Cout)
    w2a = xavier(k2, IN_CH, OUT_CH, (IN_CH, OUT_CH))
    # path_2[1]: depthwise Conv2d(64, 64, 3x3, groups=64) stored as (9, Cout):
    #            wdw[3*ki+kj, c] == torch_weight[c, 0, ki, kj]
    wdw = xavier(k3, NUM_TAPS, NUM_TAPS * OUT_CH, (NUM_TAPS, OUT_CH))
    gamma1 = jax.random.uniform(k4, (OUT_CH,), jnp.float32, 0.5, 1.5)
    beta1 = jax.random.uniform(k5, (OUT_CH,), jnp.float32, -0.1, 0.1)
    gamma2 = jax.random.uniform(k6, (OUT_CH,), jnp.float32, 0.5, 1.5)
    beta2 = jax.random.uniform(k7, (OUT_CH,), jnp.float32, -0.1, 0.1)
    return w1, w2a, wdw, gamma1, beta1, gamma2, beta2


def fold_params(raw):
    """Fold depthwise conv + eval-mode BN into lane-padded bf16 matmul weights."""
    w1, w2a, wdw, g1, be1, g2, be2 = raw
    rm = jnp.zeros((OUT_CH,), jnp.float32)
    rv = jnp.ones((OUT_CH,), jnp.float32)
    s1 = g1 / jnp.sqrt(rv + EPS)
    b1 = be1 - rm * s1
    s2 = g2 / jnp.sqrt(rv + EPS)
    b2 = be2 - rm * s2

    # path 1: 1x1 conv * BN scale -> output lanes [0, 64)
    w1f = w1 * s1[None, :]                                            # (Cin, 64)
    w1_pad = jnp.concatenate(
        [w1f, jnp.zeros((IN_CH, OUT_CH), jnp.float32)], axis=1)       # (Cin, 128)

    # path 2: depthwise 3x3 folded into the 1x1 (W_k = w2a * wdw[k]) * BN scale
    #         -> output lanes [64, 128), contraction axis ordered tap-major.
    w2f = (w2a[None, :, :] * wdw[:, None, :]) * s2[None, None, :]     # (9, Cin, 64)
    w2f = w2f.reshape(NUM_TAPS * IN_CH, OUT_CH)
    w2_pad = jnp.concatenate(
        [jnp.zeros((NUM_TAPS * IN_CH, OUT_CH), jnp.float32), w2f], axis=1)

    bias = jnp.concatenate([b1, b2]).reshape(1, 2 * OUT_CH)
    return (w1_pad.astype(jnp.bfloat16),
            w2_pad.astype(jnp.bfloat16),
            bias.astype(jnp.float32))


def reference(x_nchw, raw):
    """Pure-JAX (lax conv) reference of the PyTorch forward (eval-mode BN),
    with the same bf16 activation/weight casts as the kernel path."""
    w1, w2a, wdw, g1, be1, g2, be2 = raw
    s1 = g1 / jnp.sqrt(1.0 + EPS)
    s2 = g2 / jnp.sqrt(1.0 + EPS)
    xb = x_nchw.astype(jnp.bfloat16).astype(jnp.float32)

    # path 1
    pooled = lax.reduce_window(xb, -jnp.inf, lax.max,
                               (1, 1, 3, 3), (1, 1, 2, 2),
                               ((0, 0), (0, 0), (1, 1), (1, 1)))
    w1_oihw = jnp.transpose(w1, (1, 0)).reshape(OUT_CH, IN_CH, 1, 1).astype(jnp.bfloat16)
    p1 = lax.conv_general_dilated(pooled.astype(jnp.bfloat16), w1_oihw, (1, 1),
                                  'VALID', preferred_element_type=jnp.float32)
    p1 = jnp.maximum(p1 * s1.reshape(1, -1, 1, 1) + be1.reshape(1, -1, 1, 1), 0.0)

    # path 2
    w2a_oihw = jnp.transpose(w2a, (1, 0)).reshape(OUT_CH, IN_CH, 1, 1).astype(jnp.bfloat16)
    y = lax.conv_general_dilated(xb.astype(jnp.bfloat16), w2a_oihw, (1, 1),
                                 'VALID', preferred_element_type=jnp.float32)
    wdw_oihw = jnp.transpose(wdw, (1, 0)).reshape(OUT_CH, 1, 3, 3)
    p2 = lax.conv_general_dilated(y, wdw_oihw, (2, 2), ((1, 1), (1, 1)),
                                  feature_group_count=OUT_CH)
    p2 = jnp.maximum(p2 * s2.reshape(1, -1, 1, 1) + be2.reshape(1, -1, 1, 1), 0.0)
    return jnp.concatenate([p1, p2], axis=1)


if __name__ == "__main__":
    key = jax.random.PRNGKey(0)
    kx, kp = jax.random.split(key)
    x = jax.random.normal(kx, (2, IN_CH, 16, 16), jnp.float32)   # NCHW like PyTorch
    raw = init_params(kp)
    folded = fold_params(raw)

    out = jax.block_until_ready(downsample(x, folded))
    assert out.shape == (2, 2 * OUT_CH, 8, 8), out.shape

    ref = jax.block_until_ready(reference(x, raw))
    np.testing.assert_allclose(np.asarray(out), np.asarray(ref),
                               rtol=2e-2, atol=2e-2)
    print("KERNEL_OK")
</pallas_src>

<mosaic_0001>
module attributes {stable_mosaic.version = 11 : i64} {
  func.func @_downsample_kernel(%arg0: i32, %arg1: memref<64x1152xbf16, #tpu.memory_space<vmem>>, %arg2: memref<64x9xf32, #tpu.memory_space<vmem>>, %arg3: memref<128x128xbf16, #tpu.memory_space<vmem>>, %arg4: memref<1152x128xbf16, #tpu.memory_space<vmem>>, %arg5: memref<1x128xf32, #tpu.memory_space<vmem>>, %arg6: memref<64x128xf32, #tpu.memory_space<vmem>>) attributes {dimension_semantics = [#tpu.dimension_semantics<parallel>], iteration_bounds = array<i64: 2>, scalar_prefetch = 0 : i64, scratch_operands = 0 : i64, tpu.core_type = #tpu.core_type<tc>, window_params = [{transform_indices = @transform_0, window_bounds = array<i64: 64, 1152>}, {transform_indices = @transform_1, window_bounds = array<i64: 64, 9>}, {pipeline_mode = #tpu.pipeline_mode<synchronous>, transform_indices = @transform_2, window_bounds = array<i64: 128, 128>}, {pipeline_mode = #tpu.pipeline_mode<synchronous>, transform_indices = @transform_3, window_bounds = array<i64: 1152, 128>}, {pipeline_mode = #tpu.pipeline_mode<synchronous>, transform_indices = @transform_4, window_bounds = array<i64: 1, 128>}, {transform_indices = @transform_5, window_bounds = array<i64: 64, 128>}]} {
    %c0 = arith.constant 0 : index
    %c0_0 = arith.constant 0 : index
    %0 = vector.load %arg2[%c0, %c0_0] : memref<64x9xf32, #tpu.memory_space<vmem>>, vector<64x9xf32>
    %c0_1 = arith.constant 0 : index
    %c0_2 = arith.constant 0 : index
    %1 = vector.load %arg1[%c0_1, %c0_2] : memref<64x1152xbf16, #tpu.memory_space<vmem>>, vector<64x128xbf16>
    %2 = arith.extf %1 : vector<64x128xbf16> to vector<64x128xf32>
    %3 = vector.extract_strided_slice %0 {offsets = [0, 0], sizes = [64, 1], strides = [1, 1]} : vector<64x9xf32> to vector<64x1xf32>
    %4 = vector.broadcast %3 : vector<64x1xf32> to vector<64x128xf32>
    %5 = arith.addf %2, %4 : vector<64x128xf32>
    %c0_3 = arith.constant 0 : index
    %c128 = arith.constant 128 : index
    %6 = vector.load %arg1[%c0_3, %c128] : memref<64x1152xbf16, #tpu.memory_space<vmem>>, vector<64x128xbf16>
    %7 = arith.extf %6 : vector<64x128xbf16> to vector<64x128xf32>
    %8 = vector.extract_strided_slice %0 {offsets = [0, 1], sizes = [64, 1], strides = [1, 1]} : vector<64x9xf32> to vector<64x1xf32>
    %9 = vector.broadcast %8 : vector<64x1xf32> to vector<64x128xf32>
    %10 = arith.addf %7, %9 : vector<64x128xf32>
    %11 = arith.maximumf %5, %10 : vector<64x128xf32>
    %c0_4 = arith.constant 0 : index
    %c256 = arith.constant 256 : index
    %12 = vector.load %arg1[%c0_4, %c256] : memref<64x1152xbf16, #tpu.memory_space<vmem>>, vector<64x128xbf16>
    %13 = arith.extf %12 : vector<64x128xbf16> to vector<64x128xf32>
    %14 = vector.extract_strided_slice %0 {offsets = [0, 2], sizes = [64, 1], strides = [1, 1]} : vector<64x9xf32> to vector<64x1xf32>
    %15 = vector.broadcast %14 : vector<64x1xf32> to vector<64x128xf32>
    %16 = arith.addf %13, %15 : vector<64x128xf32>
    %17 = arith.maximumf %11, %16 : vector<64x128xf32>
    %c0_5 = arith.constant 0 : index
    %c384 = arith.constant 384 : index
    %18 = vector.load %arg1[%c0_5, %c384] : memref<64x1152xbf16, #tpu.memory_space<vmem>>, vector<64x128xbf16>
    %19 = arith.extf %18 : vector<64x128xbf16> to vector<64x128xf32>
    %20 = vector.extract_strided_slice %0 {offsets = [0, 3], sizes = [64, 1], strides = [1, 1]} : vector<64x9xf32> to vector<64x1xf32>
    %21 = vector.broadcast %20 : vector<64x1xf32> to vector<64x128xf32>
    %22 = arith.addf %19, %21 : vector<64x128xf32>
    %23 = arith.maximumf %17, %22 : vector<64x128xf32>
    %c0_6 = arith.constant 0 : index
    %c512 = arith.constant 512 : index
    %24 = vector.load %arg1[%c0_6, %c512] : memref<64x1152xbf16, #tpu.memory_space<vmem>>, vector<64x128xbf16>
    %25 = arith.extf %24 : vector<64x128xbf16> to vector<64x128xf32>
    %26 = vector.extract_strided_slice %0 {offsets = [0, 4], sizes = [64, 1], strides = [1, 1]} : vector<64x9xf32> to vector<64x1xf32>
    %27 = vector.broadcast %26 : vector<64x1xf32> to vector<64x128xf32>
    %28 = arith.addf %25, %27 : vector<64x128xf32>
    %29 = arith.maximumf %23, %28 : vector<64x128xf32>
    %c0_7 = arith.constant 0 : index
    %c640 = arith.constant 640 : index
    %30 = vector.load %arg1[%c0_7, %c640] : memref<64x1152xbf16, #tpu.memory_space<vmem>>, vector<64x128xbf16>
    %31 = arith.extf %30 : vector<64x128xbf16> to vector<64x128xf32>
    %32 = vector.extract_strided_slice %0 {offsets = [0, 5], sizes = [64, 1], strides = [1, 1]} : vector<64x9xf32> to vector<64x1xf32>
    %33 = vector.broadcast %32 : vector<64x1xf32> to vector<64x128xf32>
    %34 = arith.addf %31, %33 : vector<64x128xf32>
    %35 = arith.maximumf %29, %34 : vector<64x128xf32>
    %c0_8 = arith.constant 0 : index
    %c768 = arith.constant 768 : index
    %36 = vector.load %arg1[%c0_8, %c768] : memref<64x1152xbf16, #tpu.memory_space<vmem>>, vector<64x128xbf16>
    %37 = arith.extf %36 : vector<64x128xbf16> to vector<64x128xf32>
    %38 = vector.extract_strided_slice %0 {offsets = [0, 6], sizes = [64, 1], strides = [1, 1]} : vector<64x9xf32> to vector<64x1xf32>
    %39 = vector.broadcast %38 : vector<64x1xf32> to vector<64x128xf32>
    %40 = arith.addf %37, %39 : vector<64x128xf32>
    %41 = arith.maximumf %35, %40 : vector<64x128xf32>
    %c0_9 = arith.constant 0 : index
    %c896 = arith.constant 896 : index
    %42 = vector.load %arg1[%c0_9, %c896] : memref<64x1152xbf16, #tpu.memory_space<vmem>>, vector<64x128xbf16>
    %43 = arith.extf %42 : vector<64x128xbf16> to vector<64x128xf32>
    %44 = vector.extract_strided_slice %0 {offsets = [0, 7], sizes = [64, 1], strides = [1, 1]} : vector<64x9xf32> to vector<64x1xf32>
    %45 = vector.broadcast %44 : vector<64x1xf32> to vector<64x128xf32>
    %46 = arith.addf %43, %45 : vector<64x128xf32>
    %47 = arith.maximumf %41, %46 : vector<64x128xf32>
    %c0_10 = arith.constant 0 : index
    %c1024 = arith.constant 1024 : index
    %48 = vector.load %arg1[%c0_10, %c1024] : memref<64x1152xbf16, #tpu.memory_space<vmem>>, vector<64x128xbf16>
    %49 = arith.extf %48 : vector<64x128xbf16> to vector<64x128xf32>
    %50 = vector.extract_strided_slice %0 {offsets = [0, 8], sizes = [64, 1], strides = [1, 1]} : vector<64x9xf32> to vector<64x1xf32>
    %51 = vector.broadcast %50 : vector<64x1xf32> to vector<64x128xf32>
    %52 = arith.addf %49, %51 : vector<64x128xf32>
    %53 = arith.maximumf %47, %52 : vector<64x128xf32>
    %54 = arith.truncf %53 : vector<64x128xf32> to vector<64x128xbf16>
    %c0_11 = arith.constant 0 : index
    %c0_12 = arith.constant 0 : index
    %55 = vector.load %arg3[%c0_11, %c0_12] : memref<128x128xbf16, #tpu.memory_space<vmem>>, vector<128x128xbf16>
    %cst = arith.constant dense<0.000000e+00> : vector<64x128xf32>
    %56 = tpu.matmul %54, %55, %cst {dimension_numbers = #tpu.dot_dimension_numbers<[1], [0], [0], [1], [0, 0, 1, 1], [], []>} : vector<64x128xbf16>, vector<128x128xbf16>, vector<64x128xf32> -> vector<64x128xf32>
    %c0_13 = arith.constant 0 : index
    %c0_14 = arith.constant 0 : index
    %57 = vector.load %arg1[%c0_13, %c0_14] : memref<64x1152xbf16, #tpu.memory_space<vmem>>, vector<64x1152xbf16>
    %c0_15 = arith.constant 0 : index
    %c0_16 = arith.constant 0 : index
    %58 = vector.load %arg4[%c0_15, %c0_16] : memref<1152x128xbf16, #tpu.memory_space<vmem>>, vector<1152x128xbf16>
    %cst_17 = arith.constant dense<0.000000e+00> : vector<64x128xf32>
    %59 = tpu.matmul %57, %58, %cst_17 {dimension_numbers = #tpu.dot_dimension_numbers<[1], [0], [0], [1], [0, 0, 1, 1], [], []>} : vector<64x1152xbf16>, vector<1152x128xbf16>, vector<64x128xf32> -> vector<64x128xf32>
    %60 = arith.addf %56, %59 : vector<64x128xf32>
    %c0_18 = arith.constant 0 : index
    %c0_19 = arith.constant 0 : index
    %61 = vector.load %arg5[%c0_18, %c0_19] : memref<1x128xf32, #tpu.memory_space<vmem>>, vector<1x128xf32>
    %62 = vector.broadcast %61 : vector<1x128xf32> to vector<64x128xf32>
    %63 = arith.addf %60, %62 : vector<64x128xf32>
    %cst_20 = arith.constant 0.000000e+00 : f32
    %64 = vector.broadcast %cst_20 : f32 to vector<64x128xf32>
    %65 = arith.maximumf %63, %64 : vector<64x128xf32>
    %c0_21 = arith.constant 0 : index
    %c0_22 = arith.constant 0 : index
    %66 = vector.load %arg6[%c0_21, %c0_22] : memref<64x128xf32, #tpu.memory_space<vmem>>, vector<64x128xf32>
    tpu.vector_store %arg6[%c0_21, %c0_22], %65 {strides = array<i32>} : memref<64x128xf32, #tpu.memory_space<vmem>>, vector<64x128xf32>,
    return
  }
  func.func @transform_0(%arg0: i32) -> (i32, i32) {
    %c0_i32 = arith.constant 0 : i32
    %c0_i32_0 = arith.constant 0 : i32
    return %arg0, %c0_i32 : i32, i32
  }
  func.func @transform_1(%arg0: i32) -> (i32, i32) {
    %c0_i32 = arith.constant 0 : i32
    %c0_i32_0 = arith.constant 0 : i32
    return %arg0, %c0_i32 : i32, i32
  }
  func.func @transform_2(%arg0: i32) -> (i32, i32) {
    %c0_i32 = arith.constant 0 : i32
    %c0_i32_0 = arith.constant 0 : i32
    %c0_i32_1 = arith.constant 0 : i32
    return %c0_i32, %c0_i32_0 : i32, i32
  }
  func.func @transform_3(%arg0: i32) -> (i32, i32) {
    %c0_i32 = arith.constant 0 : i32
    %c0_i32_0 = arith.constant 0 : i32
    %c0_i32_1 = arith.constant 0 : i32
    return %c0_i32, %c0_i32_0 : i32, i32
  }
  func.func @transform_4(%arg0: i32) -> (i32, i32) {
    %c0_i32 = arith.constant 0 : i32
    %c0_i32_0 = arith.constant 0 : i32
    %c0_i32_1 = arith.constant 0 : i32
    return %c0_i32, %c0_i32_0 : i32, i32
  }
  func.func @transform_5(%arg0: i32) -> (i32, i32) {
    %c0_i32 = arith.constant 0 : i32
    %c0_i32_0 = arith.constant 0 : i32
    return %arg0, %c0_i32 : i32, i32
  }
}

</mosaic_0001>

<bundles_post_ra>
// kernel: tpu_custom_call.1
= control target key start
LH: loop header
LB: loop body
LE: loop exit
PB: predicated region body
PF: predicated region fallthrough
CT: control target
= control target key end

     0   :  { %10 = vsyncpa [#allocation3], 0  ;;  %s3817_s0 = inlined_call_operand.hbm [shape: bf16[128,1152], index: 0, kind: input, shape index: {}]   ;;  %s3818_s1 = inlined_call_operand.vmem [shape: f32[128,9], index: 1, kind: input, shape index: {}]   ;;  %s3819_s2 = inlined_call_operand.vmem [shape: bf16[128,128], index: 2, kind: input, shape index: {}]   ;;  %s3820_s3 = inlined_call_operand.hbm [shape: bf16[1152,128], index: 3, kind: input, shape index: {}]   ;;  %s3821_s4 = inlined_call_operand.vmem [shape: f32[1,128], index: 4, kind: input, shape index: {}]   ;;  %s3822_s5 = inlined_call_operand.hbm [shape: f32[128,128], index: 5, kind: output, shape index: {}]  }
   0x1   :  { %12 = vsyncpa [#allocation3 + $0x1], 0 }
   0x2   :  { %13 = vsyncpa [#allocation6], 0 }
   0x3   :  { %14 = vsyncpa [#allocation4], 0 }
   0x4   :  { %16 = vsyncpa [#allocation4 + $0x1], 0  ;;  %s3048_s18 = smov 0   ;;  %s3050_s19 = smov 0  }
   0x5   :  { %s3052_s20 = smov 0   ;;  %s3054_s21 = smov 0  }
   0x6 LB: > { %s3069_s22 = sadd.s32 4294967295, %s2998_s21   ;;  %s2258_s23 = sadd.s32 4294967294, %s2998_s21   ;;  %s2998_s21 = sphi %s3054_s21, %s3849_s21   ;;  %s2994_s20 = sphi %s3052_s20, %s3848_s20   ;;  %s2990_s19 = sphi %s3050_s19, %s3847_s19   ;;  %s2986_s18 = sphi %s3048_s18, %s3846_s18  }
   0x7   : > { %p42_p0 = scmp.ne.s32.totalorder %s2990_s19, %s2986_s18  ;;  %p3823_p1 = scmp.eq.s32.totalorder %s3069_s22, 0 }
   0x8   : > { %p161_p3 = scmp.eq.s32.totalorder %s2258_s23, 1  ;;  %p2259_p5 = scmp.ge.s32.totalorder %s2998_s21, 1 }
   0x9   : > { %p3078_p4 = por %p3823_p1, %p42_p0  ;;  %p168_p7 = scmp.lt.s32.totalorder %s2998_s21, 3 }
   0xa   : > { %p3083_p6 = por %p161_p3, %p42_p0  ;;  %s3000_s27 = smov [#allocation5]  }
   0xb   : > { %s3827_s24 = scalar_select %p3078_p4, 1, 0 }
   0xc   : > { %s3828_s25 = scalar_select %p3083_p6, 1, 0 }
   0xd   : > { %p3088_p8 = pnand %p2259_p5, %p168_p7  ;;  %s183_s28 = sshll.u32 %s3000_s27, 4  ;;  %s184_s28 = int_to_ptr.vmem [resolvable:$true] %s183_s28 }
   0xe   : > { %s3102_s30 = sadd.s32 1, %s2998_s21   ;;  %s29_s6 = sadd.s32 1, %s2994_s20 }
   0xf   : > { %s3829_s26 = scalar_select %p3088_p8, 1, 0 }
  0x10   : > { %p2636_p9 = pneg %p3088_p8  ;;  %s26_s7 = ssub.s32 %s2998_s21, %s3102_s30 }
  0x11   : > { %s2887_s8 = scalar_lea.vmem %s184_s28, 9216  ;;  %p2895_p5 = scmp.lt.s32.totalorder %s184_s28, %s184_s28 }
  0x12   : > { %p3097_p11 = pnand %p2636_p9, %p3823_p1  ;;  %p2888_p13 = scmp.ne.s32.totalorder %s184_s28, %s2887_s8 }
  0x13   : > { %p2896_p7 = scmp.lt.s32.totalorder %s2887_s8, %s2887_s8 }
  0x14   : > { %p2878_p12 = pneg %p3097_p11 }
  0x15   : > { %p2897_p10 = por %p2896_p7, %p2895_p5 }
  0x16   : > { %p2890_p0 = pnand %p2888_p13, %p2878_p12 }
  0x18   : > { %p2891_p3 = pneg %p2890_p0 }
  0x1a   : > { %p2898_p2 = pnand %p2897_p10, %p2891_p3 }
  0x1c   : > { %2901 = shalt.err (!%p2898_p2)
}
  0x1d   : > { %s3001_s9 = smov 64   ;;  %s3002_s10 = smov 4  }
  0x1e   : > { %2639 = dma.hbm_to_vmem [thread:$0]  (!%p3097_p11), %s3820_s3, 9216, %s184_s28, [#allocation6], %s3001_s9, %s3001_s9, %s3002_s10  }
  0x1f   : > { %p27_p9 = scmp.eq.s32.totalorder %s26_s7, 0  ;;  %p36_p12 = scmp.ne.s32.totalorder %s2994_s20, %s2990_s19 }
  0x20   : > { %p37_p10 = scmp.eq.s32.totalorder %s2998_s21, 0  ;;  %p2649_p2 = scmp.lt.s32.totalorder %s2998_s21, 2 }
  0x21   : > { %s3119_s13 = scalar_select %p27_p9, %s2994_s20, %s29_s6  }
  0x22   : > { %p38_p13 = por %p37_p10, %p36_p12  ;;  %p3831_p0 = scmp.eq.s32.totalorder %s3069_s22, 1 }
  0x23   : > { %s200_s15 = sand.u32 1, %s2994_s20   ;;  %s2626_s16 = smul.u32 4608, %s2998_s21 }
  0x24   : > { %p3123_p3 = por %p3831_p0, %p36_p12  ;;  %s2625_s17 = smul.u32 288, %s200_s15 }
  0x25   : > { %s3132_s29 = scalar_lea.hbm %s3817_s0, %s2626_s16  ;;  %p3134_p11 = pnand %p2649_p2, %p38_p13 }
  0x26   : > { %s3832_s14 = scalar_select %p3123_p3, 1, 0 }
  0x27   : > { %s204_s6 = scalar_lea.vmem [#allocation2], %s2625_s17  ;;  %s3140_s8 = scalar_lea.sflag [#allocation3], %s200_s15 }
  0x28   : > { %s212_s7 = sshll.u32 %s204_s6, 4  ;;  %s2902_s9 = scalar_lea.hbm %s3132_s29, 4608  ;;  %s3138_s7 = int_to_ptr.vmem [resolvable:$true] %s212_s7 }
  0x29   : > { %p2903_p5 = scmp.ne.s32.totalorder %s3132_s29, %s2902_s9  ;;  %p2904_p7 = pneg %p3134_p11 }
  0x2a   : > { %s2907_s12 = scalar_lea.hbm %s3817_s0, 9216  ;;  %p2908_p10 = scmp.lt.s32.totalorder %s3132_s29, %s3817_s0 }
  0x2b   : > { %p2905_p9 = pnand %p2904_p7, %p2903_p5  ;;  %p2909_p2 = scmp.lt.s32.totalorder %s2907_s12, %s2902_s9 }
  0x2d   : > { %p2906_p12 = pneg %p2905_p9  ;;  %p2910_p13 = por %p2909_p2, %p2908_p10 }
  0x2f   : > { %p2911_p0 = pnand %p2910_p13, %p2906_p12 }
  0x31   : > { %2914 = shalt.err (!%p2911_p0)
}
  0x32   : > { %s2915_s15 = scalar_lea.vmem %s3138_s7, 4608  ;;  %s3003_s17 = smov [#allocation2]  }
  0x33   : > { %p2916_p1 = scmp.ne.s32.totalorder %s3138_s7, %s2915_s15  ;;  %s2920_s27 = sshll.u32 %s3003_s17, 4  ;;  %s2921_s27 = int_to_ptr.vmem [resolvable:$false] %s2920_s27 }
  0x34   : > { %s2922_s6 = scalar_lea.vmem %s2921_s27, 9216  ;;  %p2923_p9 = scmp.lt.s32.totalorder %s3138_s7, %s2921_s27 }
  0x35   : > { %p2918_p6 = pnand %p2916_p1, %p2904_p7  ;;  %p2924_p3 = scmp.lt.s32.totalorder %s2922_s6, %s2915_s15 }
  0x37   : > { %p2919_p5 = pneg %p2918_p6  ;;  %p2925_p4 = por %p2924_p3, %p2923_p9 }
  0x39   : > { %p2926_p8 = pnand %p2925_p4, %p2919_p5 }
  0x3b   : > { %2929 = shalt.err (!%p2926_p8)
}
  0x3c   : > { %s3004_s9 = smov 576   ;;  %s3005_s10 = smov 36  }
  0x3d   : > { %2643 = dma.hbm_to_vmem [thread:$0]  (!%p3134_p11), %s3132_s29, 4608, %s3138_s7, %s3140_s8, %s3004_s9, %s3004_s9, %s3005_s10  }
  0x3e   : > { %p3834_p1 = scmp.ne.s32.totalorder %s3829_s26, 0 }
  0x40   : > { %233 = sbr.rel (%p3834_p1) target bundleno = 636 (0x27c), region = 40 }
  0x45   : > { %s3164_s11 = sand.u32 1, %s2990_s19   ;;  %p3835_p4 = scmp.ne.s32.totalorder %s3827_s24, 0 }
  0x46   : > { %s2627_s12 = smul.u32 288, %s3164_s11  ;;  %s236_s16 = scalar_lea.sflag [#allocation3], %s3164_s11 }
  0x48   : > { %s3168_s23 = scalar_lea.vmem [#allocation2], %s2627_s12 }
  0x49   : > { %2973 = dma.done.wait (%p3835_p4), %s236_s16, 4608  }
  0x4a   : > { %2975 = vsyncadd (%p3835_p4), %s236_s16, 4294962688  ;;  %p3836_p6 = scmp.eq.s32.totalorder %s3069_s22, 0 }
  0x4c   : > { %2977 = dma.done.wait (%p3836_p6), [#allocation6], 9216   ;;  %p3837_p8 = pmov %p3836_p6 }
  0x4d   : > { %s2268_s26 = sshll.u32 %s3069_s22, 3  ;;  %v3006_v0 = vmov 1   ;;  %v3007_v1 = vmov 0   ;;  %v3008_v8 = vmov 2   ;;  %v3009_v11 = vmov 3   ;;  %v2738_v12 = vld [vmem:[#allocation5 + $0x78] sm:$0xff]  }
  0x4e   : > { %2979 = vsyncadd (%p3837_p8), [#allocation6], 4294958080  ;;  %2701 = vset.pattern.permute.xlu1 %v3006_v0  ;;  %2700 = vset.pattern.permute.xlu0 %v3007_v1  ;;  %p277_p3 = scmp.lt.s32.totalorder %s2268_s26, 15  ;;  %v2739_v13 = vld [vmem:[#allocation5 + $0x38] sm:$0xff]   ;;  %v2740_v14 = vld [vmem:[#allocation5 + $0x70] sm:$0xff]   ;;  %v3010_v15 = vmov 4  }
  0x4f   : > { %2393 = vmatprep.subr.bf16.mxu0 %v2738_v12  ;;  %v2741_v16 = vld [vmem:[#allocation5 + $0x30] sm:$0xff]   ;;  %v2742_v17 = vld [vmem:[#allocation5 + $0x68] sm:$0xff]   ;;  %v2744_v19 = vld [vmem:[#allocation5 + $0x60] sm:$0xff]   ;;  %v3011_v31 = vmov 5   ;;  %v3012_v33 = vmov 8   ;;  %v3013_v56 = vmov 6  }
  0x50   : > { %s3851_s26 = smov (!%p277_p3, %s2268_s26), 15  ;;  %2394 = vmatpush3.bf16.msra.mxu0 %v2739_v13  ;;  %v2743_v18 = vld [vmem:[#allocation5 + $0x28] sm:$0xff]   ;;  %v2745_v20 = vld [vmem:[#allocation5 + $0x20] sm:$0xff]   ;;  %v2746_v21 = vld [vmem:[#allocation5 + $0x58] sm:$0xff]   ;;  %s2267_s27 = sshll.u32 %s3164_s11, 6 }
  0x51   : > { %s2269_s29 = sshll.u32 %s3851_s26, 3  ;;  %2395 = vmatprep.subr.bf16.mxu0 %v2740_v14  ;;  %v2747_v22 = vld [vmem:[#allocation5 + $0x18] sm:$0xff]   ;;  %v2748_v23 = vld [vmem:[#allocation5 + $0x50] sm:$0xff]   ;;  %v2752_v27 = vld [vmem:[#allocation5 + $0x48] sm:$0xff]   ;;  %s3734_s6 = scalar_lea.vmem [#allocation7], %s2267_s27 }
  0x52   : > { %s3184_s7 = scalar_lea.vmem %s3818_s1, %s2269_s29  ;;  %v2749_v24 = vld [vmem:[#allocation5 + $0x10] sm:$0xff]   ;;  %v2750_v25 = vld [vmem:[#allocation5 + $0xf8] sm:$0xff]   ;;  %v2753_v28 = vld [vmem:[#allocation5 + $0x8] sm:$0xff]   ;;  %s2163_s9 = sshll.u32 %s3734_s6, 4  ;;  %s3765_s9 = int_to_ptr.vmem [resolvable:$true] %s2163_s9 }
  0x53   : > { %v3187_v2 = vld [vmem:[%s3184_s7] sm:$0xff]  ;;  %v3192_v3 = vld [vmem:[%s3184_s7 + $0x8] sm:$0xff]  ;;  %v3195_v4 = vld [vmem:[%s3184_s7 + $0x10] sm:$0xff]  ;;  %2433 = vmatprep.subr.bf16.mxu1 %v2750_v25  ;;  %s2392_s10 = sshll.u32 %s3069_s22, 10  ;;  %s2150_s29 = scalar_lea.sflag [#allocation4], %s3164_s11 }
  0x54   : > { %373 = vperm.xlu1 %2701, %v3187_v2   ;;  %310 = vperm.xlu0 %2700, %v3187_v2   ;;  %v3200_v5 = vld [vmem:[%s3184_s7 + $0x18] sm:$0xff]  ;;  %v3203_v6 = vld [vmem:[%s3184_s7 + $0x20] sm:$0xff]  ;;  %v3210_v7 = vld [vmem:[%s3184_s7 + $0x30] sm:$0xff]  ;;  %s3772_s26 = scalar_lea.hbm %s3822_s5, %s2392_s10  ;;  %s2930_s28 = scalar_lea.vmem %s3765_s9, 1024 }
  0x55   : > { %v3220_v9 = vld [vmem:[%s3184_s7 + $0x28] sm:$0xff]  ;;  %v3225_v10 = vld [vmem:[%s3184_s7 + $0x38] sm:$0xff]  ;;  %2396 = vmatpush3.bf16.msra.mxu0 %v2741_v16  ;;  %v2754_v29 = vld [vmem:[#allocation5 + $0xf0] sm:$0xff]   ;;  %p2931_p11 = scmp.ne.s32.totalorder %s3765_s9, %s2930_s28  ;;  %p3843_p7 = scmp.ne.s32.totalorder %s3832_s14, 0 }
  0x56   : > { %2397 = vmatprep.subr.bf16.mxu0 %v2742_v17  ;;  %v2751_v26 = vld [vmem:[#allocation5 + $0xb8] sm:$0xff]   ;;  %v2755_v30 = vld [vmem:[#allocation5 + $0xb0] sm:$0xff]   ;;  %v2756_v32 = vld [vmem:[#allocation5 + $0x40] sm:$0xff]   ;;  %s3015_s22 = smov [#allocation7]  }
  0x57   : > { %2434 = vmatpush3.bf16.msra.mxu1 %v2751_v26  ;;  %v2758_v34 = vld [vmem:[#allocation5] sm:$0xff]   ;;  %v2759_v35 = vld [vmem:[#allocation5 + $0xe8] sm:$0xff]   ;;  %v2764_v39 = vld [vmem:[#allocation5 + $0x178] sm:$0xff]   ;;  %p2932_p12 = pnand %p2931_p11, %p3843_p7  ;;  %s2934_s24 = sshll.u32 %s3015_s22, 4  ;;  %s2935_s24 = int_to_ptr.vmem [resolvable:$false] %s2934_s24 }
  0x58   : > { %377 = vperm.xlu1 %2701, %v3192_v3   ;;  %315 = vperm.xlu0 %2700, %v3192_v3   ;;  %v2760_v36 = vld [vmem:[#allocation5 + $0xa8] sm:$0xff]   ;;  %v2761_v38 = vld [vmem:[%s3168_s23] ss:$36 sps:$4 sm:$0xff]   ;;  %v2766_v41 = vld [vmem:[#allocation5 + $0x138] sm:$0xff]   ;;  %s2936_s8 = scalar_lea.vmem %s2935_s24, 2048  ;;  %p2937_p2 = scmp.lt.s32.totalorder %s3765_s9, %s2935_s24 }
  0x59   : > { %2398 = vmatpush3.bf16.msra.mxu0 %v2743_v18  ;;  %2435 = vmatprep.subr.bf16.mxu1 %v2754_v29  ;;  %v2763_v37 = vld [vmem:[%s3168_s23 + $0x4] ss:$36 sps:$4 sm:$0xff]   ;;  %v2768_v43 = vld [vmem:[#allocation5 + $0x170] sm:$0xff]   ;;  %v2769_v44 = vld [vmem:[#allocation5 + $0xd8] sm:$0xff]   ;;  %p2933_p10 = pneg %p2932_p12  ;;  %p2938_p13 = scmp.lt.s32.totalorder %s2936_s8, %s2930_s28 }
  0x5a   : > { %2399 = vmatprep.subr.bf16.mxu0 %v2744_v19  ;;  %1712 = vmatprep.mubr.bf16.mxu0 %v2763_v37  ;;  %v2765_v40 = vld [vmem:[#allocation5 + $0xe0] sm:$0xff]   ;;  %v2770_v45 = vld [vmem:[#allocation5 + $0x130] sm:$0xff]   ;;  %v2771_v46 = vld [vmem:[#allocation5 + $0x98] sm:$0xff]  }
  0x5b   : > { %2436 = vmatpush3.bf16.msra.mxu1 %v2755_v30  ;;  %v2767_v42 = vld [vmem:[#allocation5 + $0xa0] sm:$0xff]   ;;  %v2772_v47 = vld [vmem:[%s3168_s23 + $0x4c] ss:$36 sps:$4 sm:$0xff]   ;;  %v2783_v57 = vld [vmem:[%s3168_s23 + $0x94] ss:$36 sps:$4 sm:$0xff]   ;;  %p2939_p0 = por %p2938_p13, %p2937_p2 }
  0x5c   : > { %2702 = vset.pattern.permute.xlu1 %v3007_v1  ;;  %320 = vperm.xlu0 %2700, %v3195_v4   ;;  %v2774_v48 = vld [vmem:[%s3168_s23 + $0x48] ss:$36 sps:$4 sm:$0xff]   ;;  %v2776_v50 = vld [vmem:[#allocation5 + $0xd0] sm:$0xff]   ;;  %v2779_v52 = vld [vmem:[#allocation5 + $0x160] sm:$0xff]  }
  0x5d   : > { %325 = vperm.xlu1 %2702, %v3200_v5   ;;  %2400 = vmatpush3.bf16.msra.mxu0 %v2745_v20  ;;  %v2775_v49 = vld [vmem:[#allocation5 + $0x168] sm:$0xff]   ;;  %v2778_v53 = vld [vmem:[#allocation5 + $0x90] sm:$0xff]   ;;  %v2781_v54 = vld [vmem:[#allocation5 + $0x120] sm:$0xff]   ;;  %p2940_p5 = pnand %p2939_p0, %p2933_p10 }
  0x5e   : > { %2401 = vmatprep.subr.bf16.mxu0 %v2746_v21  ;;  %2437 = vmatprep.subr.bf16.mxu1 %v2759_v35  ;;  %v2777_v51 = vld [vmem:[#allocation5 + $0x128] sm:$0xff]   ;;  %v2786_v58 = vld [vmem:[#allocation5 + $0x158] sm:$0xff]   ;;  %v2785_v60 = vld [vmem:[%s3168_s23 + $0x90] ss:$36 sps:$4 sm:$0xff]   ;;  %v3014_v21 = vmov 7  }
  0x5f   : > { %2438 = vmatpush3.bf16.msra.mxu1 %v2760_v36  ;;  %v2780_v55 = vld [vmem:[#allocation5 + $0xc8] sm:$0xff]   ;;  %v2787_v61 = vld [vmem:[#allocation5 + $0xc0] sm:$0xff]   ;;  %v2788_v62 = vld [vmem:[#allocation5 + $0x118] sm:$0xff]  }
  0x60   : > { %330 = vperm.xlu0 %2700, %v3203_v6   ;;  %2439 = vmatprep.subr.bf16.mxu1 %v2765_v40  ;;  %v2782_v59 = vld [vmem:[#allocation5 + $0x88] sm:$0xff]   ;;  %v2794_v12 = vld [vmem:[#allocation5 + $0x110] sm:$0xff]   ;;  %v2795_v13 = vld [vmem:[#allocation5 + $0x1f8] sm:$0xff]  }
  0x61   : > { %2703 = vset.pattern.permute.xlu1 %v3006_v0  ;;  %2402 = vmatpush3.bf16.msra.mxu0 %v2747_v22  ;;  %v2792_v63 = vld [vmem:[%s3168_s23 + $0xc] ss:$36 sps:$4 sm:$0xff]   ;;  %v2797_v14 = vld [vmem:[%s3168_s23 + $0xdc] ss:$36 sps:$4 sm:$0xff]   ;;  %v2813_v29 = vld [vmem:[%s3168_s23 + $0x14] ss:$36 sps:$4 sm:$0xff]  }
  0x62   : > { %385 = vperm.xlu1 %2703, %v3200_v5   ;;  %2403 = vmatprep.subr.bf16.mxu0 %v2748_v23  ;;  %v2790_v16 = vld [vmem:[%s3168_s23 + $0x8] ss:$36 sps:$4 sm:$0xff]   ;;  %v2796_v18 = vld [vmem:[#allocation5 + $0x1b8] sm:$0xff]   ;;  %v2802_v20 = vld [vmem:[#allocation5 + $0x1f0] sm:$0xff]  }
  0x63   : > { %2440 = vmatpush3.bf16.msra.mxu1 %v2767_v42  ;;  %1777 = vmatprep.mubr.bf16.mxu1 %v2792_v63  ;;  %v2800_v17 = vld [vmem:[#allocation5 + $0x148] sm:$0xff]   ;;  %v2799_v19 = vld [vmem:[%s3168_s23 + $0xd8] ss:$36 sps:$4 sm:$0xff]   ;;  %v2803_v25 = vld [vmem:[#allocation5 + $0x1b0] sm:$0xff]  }
  0x64   : > { %340 = vperm.xlu0 %2700, %v3210_v7   ;;  %2441 = vmatprep.subr.bf16.mxu1 %v2769_v44  ;;  %v2801_v22 = vld [vmem:[#allocation5 + $0x108] sm:$0xff]   ;;  %v2804_v23 = vld [vmem:[%s3168_s23 + $0x54] ss:$36 sps:$4 sm:$0xff]   ;;  %v2817_v35 = vld [vmem:[%s3168_s23 + $0x9c] ss:$36 sps:$4 sm:$0xff]  }
  0x65   : > { %2404 = vmatpush3.bf16.msra.mxu0 %v2749_v24  ;;  %v2806_v24 = vld [vmem:[#allocation5 + $0x140] sm:$0xff]   ;;  %v2809_v26 = vld [vmem:[#allocation5 + $0x1e8] sm:$0xff]   ;;  %v2814_v30 = vld [vmem:[#allocation5 + $0x238] sm:$0xff]  }
  0x66   : > { %2704 = vset.pattern.permute.xlu1 %v3008_v8  ;;  %2405 = vmatprep.subr.bf16.mxu0 %v2752_v27  ;;  %v2807_v27 = vld [vmem:[%s3168_s23 + $0x50] ss:$36 sps:$4 sm:$0xff]   ;;  %v2821_v36 = vld [vmem:[#allocation5 + $0x1d8] sm:$0xff]   ;;  %v2831_v44 = vld [vmem:[#allocation5 + $0x220] sm:$0xff]  }
  0x67   : > { %437 = vperm.xlu1 %2704, %v3187_v2   ;;  %2442 = vmatpush3.bf16.msra.mxu1 %v2771_v46  ;;  %v2820_v37 = vld [vmem:[%s3168_s23 + $0x98] ss:$36 sps:$4 sm:$0xff]   ;;  %v2828_v42 = vld [vmem:[#allocation5 + $0x190] sm:$0xff]   ;;  %v2835_v46 = vld [vmem:[%s3168_s23 + $0xa4] ss:$36 sps:$4 sm:$0xff]  }
  0x68   : > { %2710 = vset.pattern.permute.xlu0 %v3006_v0  ;;  %2443 = vmatprep.subr.bf16.mxu1 %v2776_v50  ;;  %v2825_v40 = vld [vmem:[%s3168_s23 + $0x58] ss:$36 sps:$4 sm:$0xff]  }
  0x69   : > { %381 = vperm.xlu0 %2710, %v3195_v4   ;;  %2406 = vmatpush3.bf16.msra.mxu0 %v2753_v28  ;;  %v2808_v28 = vld [vmem:[#allocation5 + $0x100] sm:$0xff]   ;;  %v2838_v50 = vld [vmem:[#allocation5 + $0x218] sm:$0xff]  }
  0x6a   : > { %2407 = vmatprep.subr.bf16.mxu0 %v2756_v32  ;;  %v2811_v32 = vld [vmem:[%s3168_s23 + $0x10] ss:$36 sps:$4 sm:$0xff]  }
  0x6b   : > { %445 = vperm.xlu1 %2704, %v3195_v4   ;;  %2444 = vmatpush3.bf16.msra.mxu1 %v2778_v53 }
  0x6c   : > { %2445 = vmatprep.subr.bf16.mxu1 %v2780_v55  ;;  %v2843_v55 = vld [vmem:[%s3168_s23 + $0x1c] ss:$36 sps:$4 sm:$0xff]  }
  0x6d   : > { %393 = vperm.xlu0 %2710, %v3220_v9   ;;  %2408 = vmatpush3.bf16.msra.mxu0 %v2758_v34  ;;  %v2815_v34 = vld [vmem:[#allocation5 + $0x1e0] sm:$0xff]  }
  0x6e   : > { %2473 = vmatprep.subr.bf16.mxu0 %v2764_v39  ;;  %v2826_v39 = vld [vmem:[#allocation5 + $0x228] sm:$0xff]  }
  0x6f   : > { %449 = vperm.xlu1 %2704, %v3200_v5   ;;  %2446 = vmatpush3.bf16.msra.mxu1 %v2782_v59  ;;  %v2845_v59 = vld [vmem:[%s3168_s23 + $0xec] ss:$36 sps:$4 sm:$0xff]  }
  0x70   : > { %1713 = vmatmul.mubr.bf16.vlgmr.msra.gmra.mxu0 %v2761_v38  ;;  %2447 = vmatprep.subr.bf16.mxu1 %v2787_v61  ;;  %v2823_v38 = vld [vmem:[%s3168_s23 + $0x5c] ss:$36 sps:$4 sm:$0xff]  }
  0x71   : > { %401 = vperm.xlu0 %2710, %v3225_v10   ;;  %2474 = vmatpush3.bf16.msra.mxu0 %v2766_v41  ;;  %v2827_v41 = vld [vmem:[#allocation5 + $0x1d0] sm:$0xff]  }
  0x72   : > { %2475 = vmatprep.subr.bf16.mxu0 %v2768_v43  ;;  %1720 = vmatprep.mubr.bf16.mxu0 %v2772_v47  ;;  %v2829_v43 = vld [vmem:[%s3168_s23 + $0xe4] ss:$36 sps:$4 sm:$0xff]  }
  0x73   : > { %2705 = vset.pattern.permute.xlu1 %v3009_v11  ;;  %v3310_v47 = vld [vmem:[%s3168_s23 + $0x4] sm:$0xff]  }
  0x74   : > { %505 = vperm.xlu1 %2705, %v3192_v3   ;;  %v364_v53 = vunpack.c.l.bf16 %v3310_v47 }
  0x75   : > { %2713 = vset.pattern.permute.xlu0 %v3008_v8  ;;  %2476 = vmatpush3.bf16.msra.mxu0 %v2770_v45  ;;  %v2833_v45 = vld [vmem:[#allocation5 + $0x1c8] sm:$0xff]  }
  0x76   : > { %441 = vperm.xlu0 %2713, %v3192_v3   ;;  %2477 = vmatprep.subr.bf16.mxu0 %v2775_v49  ;;  %v2834_v49 = vld [vmem:[#allocation5 + $0x188] sm:$0xff]  }
  0x78   : > { %509 = vperm.xlu1 %2705, %v3195_v4   ;;  %1721 = vmatmul.mubr.bf16.gmra.mxu0 %v2774_v48  ;;  %v292_v48 = vld [vmem:[%s3168_s23] ss:$36 sps:$4 sm:$0xff]  }
  0x79   : > { %2478 = vmatpush3.bf16.msra.mxu0 %v2777_v51  ;;  %1728 = vmatprep.mubr.bf16.mxu0 %v2783_v57  ;;  %v2837_v51 = vld [vmem:[%s3168_s23 + $0xa0] ss:$36 sps:$4 sm:$0xff]   ;;  %v3319_v57 = vld [vmem:[%s3168_s23 + $0x28] sm:$0xff]  }
  0x7a   : > { %453 = vperm.xlu0 %2713, %v3203_v6   ;;  %2479 = vmatprep.subr.bf16.mxu0 %v2779_v52  ;;  %v2839_v52 = vld [vmem:[#allocation5 + $0x1c0] sm:$0xff]  }
  0x7c   : > { %2706 = vset.pattern.permute.xlu1 %v3010_v15 }
  0x7d   : > { %565 = vperm.xlu1 %2706, %v3187_v2   ;;  %2480 = vmatpush3.bf16.msra.mxu0 %v2781_v54  ;;  %v300_v54 = vunpack.c.l.bf16 %v292_v48 }
  0x7e   : > { %2715 = vset.pattern.permute.xlu0 %v3009_v11  ;;  %2481 = vmatprep.subr.bf16.mxu0 %v2786_v58  ;;  %v2840_v58 = vld [vmem:[#allocation5 + $0x180] sm:$0xff]  }
  0x7f   : > { %501 = vperm.xlu0 %2715, %v3187_v2  }
  0x80   : > { %1729 = vmatmul.mubr.bf16.gmra.mxu0 %v2785_v60 }
  0x81   : > { %573 = vperm.xlu1 %2706, %v3195_v4   ;;  %2482 = vmatpush3.bf16.msra.mxu0 %v2788_v62  ;;  %v2844_v62 = vld [vmem:[#allocation5 + $0x210] sm:$0xff]  }
  0x82   : > { %1736 = vmatprep.mubr.bf16.mxu0 %v2797_v14  ;;  %v2848_v14 = vld [vmem:[#allocation5 + $0x208] sm:$0xff]  }
  0x83   : > { %513 = vperm.xlu0 %2715, %v3200_v5  }
  0x85   : > { %577 = vperm.xlu1 %2706, %v3200_v5  }
  0x87   : > { %517 = vperm.xlu0 %2715, %v3203_v6  }
  0x88   : > { %1737 = vmatmul.mubr.bf16.gmra.mxu0 %v2799_v19  ;;  %v2849_v19 = vld [vmem:[%s3168_s23 + $0x64] ss:$36 sps:$4 sm:$0xff]  }
  0x89   : > { %2707 = vset.pattern.permute.xlu1 %v3007_v1  ;;  %1842 = vmatprep.mubr.bf16.mxu0 %v2813_v29  ;;  %v2855_v29 = vld [vmem:[%s3819_s2 + $0x30] sm:$0xff]  }
  0x8a   : > { %335 = vperm.xlu1 %2707, %v3220_v9  }
  0x8b   : > { %2720 = vset.pattern.permute.xlu0 %v3010_v15 }
  0x8c   : > { %569 = vperm.xlu0 %2720, %v3192_v3  }
  0x8e   : > { %2708 = vset.pattern.permute.xlu1 %v3006_v0 }
  0x8f   : > { %389 = vperm.xlu1 %2708, %v3203_v6  }
  0x90   : > { %581 = vperm.xlu0 %2720, %v3203_v6  }
  0x93   : > { %2709 = vset.pattern.permute.xlu1 %v3011_v31 }
  0x94   : > { %629 = vperm.xlu1 %2709, %v3187_v2   ;;  %2727 = vset.pattern.permute.xlu0 %v3012_v33 }
  0x95   : > { %825 = vperm.xlu0 %2727, %v3192_v3  }
  0x98   : > { %633 = vperm.xlu1 %2709, %v3192_v3  }
  0x99   : > { %829 = vperm.xlu0 %2727, %v3195_v4  }
  0x9c   : > { %2711 = vset.pattern.permute.xlu1 %v3007_v1  ;;  %v2789_v1 = vld [vmem:[#allocation5 + $0x80] sm:$0xff]  }
  0x9d   : > { %345 = vperm.xlu1 %2711, %v3225_v10   ;;  %2730 = vset.pattern.permute.xlu0 %v3011_v31 }
  0x9e   : > { %645 = vperm.xlu0 %2730, %v3203_v6   ;;  %2448 = vmatpush3.bf16.msra.mxu1 %v2789_v1  ;;  %v301_v1 = vunpack.c.h.bf16 %v292_v48 }
  0x9f   : > { %2513 = vmatprep.subr.bf16.mxu1 %v2795_v13 }
  0xa1   : > { %2712 = vset.pattern.permute.xlu1 %v3006_v0  ;;  %v2793_v0 = vld [vmem:[#allocation5 + $0x150] sm:$0xff]   ;;  %1778 = vmatmul.mubr.bf16.vlgmr.msra.gmra.mxu1 %v2790_v16 }
  0xa2   : > { %397 = vperm.xlu1 %2712, %v3210_v7   ;;  %657 = vperm.xlu0 %2730, %v3225_v10  }
  0xa3   : > { %2483 = vmatprep.subr.bf16.mxu0 %v2793_v0  ;;  %2514 = vmatpush3.bf16.msra.mxu1 %v2796_v18  ;;  %v2847_v18 = vld [vmem:[%s3168_s23 + $0xe8] ss:$36 sps:$4 sm:$0xff]  }
  0xa4   : > { %2484 = vmatpush3.bf16.msra.mxu0 %v2794_v12  ;;  %2515 = vmatprep.subr.bf16.mxu1 %v2802_v20  ;;  %v2841_v12 = vld [vmem:[%s3168_s23 + $0x18] ss:$36 sps:$4 sm:$0xff]  }
  0xa5   : > { %2485 = vmatprep.subr.bf16.mxu0 %v2800_v17  ;;  %1785 = vmatprep.mubr.bf16.mxu1 %v2804_v23  ;;  %v3342_v23 = vld [vmem:[%s3168_s23 + $0x44] sm:$0xf] }
  0xa6   : > { %2714 = vset.pattern.permute.xlu1 %v3011_v31  ;;  %2732 = vset.pattern.permute.xlu0 %v3013_v56 }
  0xa7   : > { %637 = vperm.xlu1 %2714, %v3195_v4   ;;  %697 = vperm.xlu0 %2732, %v3192_v3  }
  0xa8   : > { %2486 = vmatpush3.bf16.msra.mxu0 %v2801_v22  ;;  %2516 = vmatpush3.bf16.msra.mxu1 %v2803_v25  ;;  %v2851_v25 = vld [vmem:[#allocation5 + $0x200] sm:$0xff]  }
  0xa9   : > { %2487 = vmatprep.subr.bf16.mxu0 %v2806_v24  ;;  %2517 = vmatprep.subr.bf16.mxu1 %v2809_v26 }
  0xaa   : > { %1786 = vmatmul.mubr.bf16.gmra.mxu1 %v2807_v27  ;;  %v295_v27 = vld [vmem:[%s3168_s23 + $0x6c] sm:$0xff]  }
  0xab   : > { %641 = vperm.xlu1 %2714, %v3200_v5   ;;  %701 = vperm.xlu0 %2732, %v3195_v4  }
  0xac   : > { %2488 = vmatpush3.bf16.msra.mxu0 %v2808_v28  ;;  %1793 = vmatprep.mubr.bf16.mxu1 %v2817_v35  ;;  %v3362_v35 = vld [vmem:[%s3184_s7 + $0x18] sm:$0xff] }
  0xad   : > { %2577 = vmatprep.subr.bf16.mxu0 %v2814_v30 }
  0xaf   : > { %2716 = vset.pattern.permute.xlu1 %v3008_v8  ;;  %713 = vperm.xlu0 %2732, %v3220_v9  }
  0xb0   : > { %457 = vperm.xlu1 %2716, %v3220_v9   ;;  %1843 = vmatmul.mubr.bf16.vlgmr.msra.gmra.mxu0 %v2811_v32  ;;  %v303_v32 = vunpack.c.l.bf16 %v295_v27 }
  0xb1   : > { %2578 = vmatpush3.bf16.msra.mxu0 %v2814_v30  ;;  %1850 = vmatprep.mubr.bf16.mxu0 %v2823_v38  ;;  %v2853_v30 = vld [vmem:[%s3168_s23 + $0x60] ss:$36 sps:$4 sm:$0xff]  }
  0xb2   : > { %1794 = vmatmul.mubr.bf16.gmra.mxu1 %v2820_v37  ;;  %v2858_v37 = vld [vmem:[%s3819_s2 + $0x28] sm:$0xff]  }
  0xb3   : > { %2734 = vset.pattern.permute.xlu0 %v3014_v21  ;;  %1801 = vmatprep.mubr.bf16.mxu1 %v2829_v43 }
  0xb4   : > { %2717 = vset.pattern.permute.xlu1 %v3013_v56  ;;  %761 = vperm.xlu0 %2734, %v3192_v3   ;;  %v2810_v3 = vld [vmem:[#allocation5 + $0x1a8] sm:$0xff]  }
  0xb5   : > { %693 = vperm.xlu1 %2717, %v3187_v2   ;;  %2518 = vmatpush3.bf16.msra.mxu1 %v2810_v3 }
  0xb6   : > { %2519 = vmatprep.subr.bf16.mxu1 %v2815_v34  ;;  %v367_v34 = vunpack.c.h.bf16 %v295_v27 }
  0xb8   : > { %765 = vperm.xlu0 %2734, %v3195_v4   ;;  %v2816_v4 = vld [vmem:[#allocation5 + $0x1a0] sm:$0xff]   ;;  %1851 = vmatmul.mubr.bf16.gmra.mxu0 %v2825_v40 }
  0xb9   : > { %2718 = vset.pattern.permute.xlu1 %v3008_v8  ;;  %v2819_v8 = vld [vmem:[#allocation5 + $0x230] sm:$0xff]   ;;  %2520 = vmatpush3.bf16.msra.mxu1 %v2816_v4 }
  0xba   : > { %461 = vperm.xlu1 %2718, %v3210_v7   ;;  %2579 = vmatprep.subr.bf16.mxu0 %v2819_v8 }
  0xbb   : > { %2521 = vmatprep.subr.bf16.mxu1 %v2821_v36  ;;  %2580 = vmatpush3.bf16.msra.mxu0 %v2819_v8  ;;  %v3368_v8 = vld [vmem:[%s3168_s23 + $0x68] sm:$0xf]  ;;  %v2856_v36 = vld [vmem:[%s3168_s23 + $0xac] ss:$36 sps:$4 sm:$0xff]  }
  0xbc   : > { %773 = vperm.xlu0 %2734, %v3203_v6   ;;  %v2822_v6 = vld [vmem:[#allocation5 + $0x198] sm:$0xff]   ;;  %2581 = vmatprep.subr.bf16.mxu0 %v2826_v39 }
  0xbd   : > { %2522 = vmatpush3.bf16.msra.mxu1 %v2822_v6  ;;  %1858 = vmatprep.mubr.bf16.mxu0 %v2835_v46  ;;  %v294_v6 = vld [vmem:[%s3168_s23 + $0x48] sm:$0xff]   ;;  %v3386_v46 = vld [vmem:[%s3168_s23 + $0x50] sm:$0xff]  }
  0xbe   : > { %465 = vperm.xlu1 %2718, %v3225_v10   ;;  %2523 = vmatprep.subr.bf16.mxu1 %v2827_v41  ;;  %v366_v48 = vunpack.c.h.bf16 %v294_v6 }
  0xbf   : > { %2582 = vmatpush3.bf16.msra.mxu0 %v2826_v39 }
  0xc0   : > { %785 = vperm.xlu0 %2734, %v3225_v10   ;;  %2583 = vmatprep.subr.bf16.mxu0 %v2831_v44 }
  0xc1   : > { %2524 = vmatpush3.bf16.msra.mxu1 %v2828_v42  ;;  %1859 = vmatmul.mubr.bf16.gmra.mxu0 %v2837_v51  ;;  %v302_v42 = vunpack.c.l.bf16 %v294_v6  ;;  %v494_v6 = vunpack.c.h.bf16 %v3386_v46 }
  0xc2   : > { %2719 = vset.pattern.permute.xlu1 %v3013_v56  ;;  %2525 = vmatprep.subr.bf16.mxu1 %v2833_v45 }
  0xc3   : > { %705 = vperm.xlu1 %2719, %v3200_v5   ;;  %v2832_v5 = vld [vmem:[%s3168_s23 + $0xe0] ss:$36 sps:$4 sm:$0xff]   ;;  %2584 = vmatpush3.bf16.msra.mxu0 %v2831_v44  ;;  %v428_v44 = vunpack.c.h.bf16 %v3310_v47 }
  0xc4   : > { %2737 = vset.pattern.permute.xlu0 %v3012_v33  ;;  %1802 = vmatmul.mubr.bf16.gmra.mxu1 %v2832_v5  ;;  %v2860_v5 = vld [vmem:[%s3819_s2 + $0x20] sm:$0xff]  }
  0xc5   : > { %841 = vperm.xlu0 %2737, %v3220_v9   ;;  %2526 = vmatpush3.bf16.msra.mxu1 %v2834_v49  ;;  %v2859_v49 = vld [vmem:[%s3168_s23 + $0xa8] ss:$36 sps:$4 sm:$0xff]  }
  0xc6   : > { %2585 = vmatprep.subr.bf16.mxu0 %v2838_v50  ;;  %2527 = vmatprep.subr.bf16.mxu1 %v2839_v52  ;;  %v430_v52 = vunpack.c.l.bf16 %v3386_v46  ;;  %v3463_v46 = vld [vmem:[%s3168_s23 + $0x10] sm:$0xff]  }
  0xc7   : > { %2721 = vset.pattern.permute.xlu1 %v3009_v11  ;;  %1907 = vmatprep.mubr.bf16.mxu1 %v2843_v55  ;;  %v3396_v55 = vld [vmem:[%s3168_s23 + $0x74] sm:$0xff]  }
  0xc8   : > { %521 = vperm.xlu1 %2721, %v3220_v9   ;;  %1866 = vmatprep.mubr.bf16.mxu0 %v2845_v59 }
  0xc9   : > { %2586 = vmatpush3.bf16.msra.mxu0 %v2838_v50  ;;  %2528 = vmatpush3.bf16.msra.mxu1 %v2840_v58 }
  0xca   : > { %2587 = vmatprep.subr.bf16.mxu0 %v2844_v62  ;;  %1867 = vmatmul.mubr.bf16.gmra.mxu0 %v2847_v18 }
  0xcc   : > { %2722 = vset.pattern.permute.xlu1 %v3014_v21  ;;  %1908 = vmatmul.mubr.bf16.vlgmr.msra.gmra.mxu1 %v2841_v12  ;;  %v3413_v12 = vld [vmem:[%s3168_s23 + $0xf8] sm:$0xf] }
  0xcd   : > { %757 = vperm.xlu1 %2722, %v3187_v2   ;;  %v365_v2 = vunpack.c.l.bf16 %v3319_v57  ;;  %2588 = vmatpush3.bf16.msra.mxu0 %v2844_v62  ;;  %v3408_v62 = vld [vmem:[%s3168_s23 + $0xd4] sm:$0xf] }
  0xce   : > { %2589 = vmatprep.subr.bf16.mxu0 %v2848_v14  ;;  %1915 = vmatprep.mubr.bf16.mxu1 %v2849_v19 }
  0xcf   : > { %v374_v60 = vpop.permute.xlu1 %373  ;;  %v311_v61 = vpop.permute.xlu0 %310 }
  0xd0   : > { %v3322_v63 = vadd.f32 %v374_v60, %v364_v53  ;;  %v3324_v0 = vadd.f32 %v311_v61, %v300_v54  ;;  %v2861_v53 = vld [vmem:[%s3168_s23 + $0xf4] ss:$36 sps:$4 sm:$0xff]   ;;  %v2871_v60 = vld [vmem:[%s3184_s7] sm:$0xff]  ;;  %v3405_v61 = vld [vmem:[%s3168_s23 + $0xb0] sm:$0xf] }
  0xd1   : > { %2723 = vset.pattern.permute.xlu1 %v3009_v11  ;;  %v2852_v11 = vld [vmem:[%s3819_s2 + $0x38] sm:$0xff]   ;;  %2590 = vmatpush3.bf16.msra.mxu0 %v2848_v14  ;;  %v431_v14 = vunpack.c.l.bf16 %v3396_v55 }
  0xd2   : > { %v412_v13 = vmax.f32 %v3324_v0, %v3322_v63  ;;  %525 = vperm.xlu1 %2723, %v3210_v7   ;;  %v3345_v7 = vld [vmem:[%s3168_s23 + $0x20] sm:$0xf]  ;;  %2601 = vmatprep.subr.bf16.mxu1 %v2852_v11  ;;  %v3416_v63 = vld [vmem:[%s3168_s23 + $0x11c] sm:$0xf] }
  0xd3   : > { %v378_v16 = vpop.permute.xlu1 %377  ;;  %v316_v17 = vpop.permute.xlu0 %315  ;;  %v2278_v26 = vcombine.low %v3345_v7, %v3342_v23  ;;  %2602 = vmatpush3.bf16.msra.mxu1 %v2852_v11  ;;  %2591 = vmatprep.subr.bf16.mxu0 %v2851_v25  ;;  %v2864_v11 = vld [vmem:[%s3168_s23 + $0xf0] ss:$36 sps:$4 sm:$0xff]  }
  0xd4   : > { %v3334_v20 = vadd.f32 %v378_v16, %v365_v2  ;;  %v3336_v22 = vadd.f32 %v316_v17, %v301_v1  ;;  %2603 = vmatprep.subr.bf16.mxu1 %v2855_v29  ;;  %1916 = vmatmul.mubr.bf16.gmra.mxu1 %v2853_v30  ;;  %v2296_v1 = vcombine.low %v3405_v61, %v3408_v62  ;;  %v2867_v17 = vld [vmem:[%s3819_s2 + $0x10] sm:$0xff]  }
  0xd5   : > { %2593 = vmatprep.mubr.bf16.mxu0 %v2278_v26  ;;  %2592 = vmatpush3.bf16.msra.mxu0 %v2851_v25  ;;  %v2305_v16 = vcombine.low %v3413_v12, %v3416_v63  ;;  %v3429_v25 = vld [vmem:[%s3184_s7 + $0x30] sm:$0xff] }
  0xd6   : > { %v413_v24 = vmax.f32 %v3336_v22, %v3334_v20  ;;  %529 = vperm.xlu1 %2723, %v3225_v10   ;;  %v3357_v10 = vld [vmem:[%s3168_s23 + $0x8c] sm:$0xf]  ;;  %1923 = vmatprep.mubr.bf16.mxu1 %v2856_v36  ;;  %v3438_v30 = vld [vmem:[%s3168_s23 + $0x30] sm:$0xff]   ;;  %v2869_v36 = vld [vmem:[%s3819_s2] sm:$0xff]  }
  0xd7   : > { %v321_v28 = vpop.permute.xlu0 %320  ;;  %v2287_v38 = vcombine.low %v3368_v8, %v3357_v10  ;;  %2604 = vmatpush3.bf16.msra.mxu1 %v2855_v29  ;;  %v2874_v20 = vld [vmem:[%s3184_s7 + $0x28] sm:$0xff] }
  0xd8   : > { %v326_v3 = vpop.permute.xlu1 %325  ;;  %2605 = vmatprep.subr.bf16.mxu1 %v2858_v37  ;;  %v350_v47 = vadd.f32 %v321_v28, %v302_v42  ;;  %v2868_v28 = vld [vmem:[%s3819_s2 + $0x8] sm:$0xff]  }
  0xd9   : > { %v351_v40 = vadd.f32 %v326_v3, %v303_v32  ;;  %2594 = vmatmul.mubr.bf16.vlgmr.msra.gmra.mxu0 %v2287_v38  ;;  %v429_v32 = vunpack.c.h.bf16 %v3319_v57 }
  0xda   : > { %2724 = vset.pattern.permute.xlu1 %v3014_v21  ;;  %2597 = vmatprep.mubr.bf16.mxu0 %v2296_v1 }
  0xdb   : > { %769 = vperm.xlu1 %2724, %v3362_v35   ;;  %v3365_v4 = vpop.permute.xlu0 %330  ;;  %2606 = vmatpush3.bf16.msra.mxu1 %v2858_v37  ;;  %v493_v37 = vunpack.c.l.bf16 %v3438_v30 }
  0xdc   : > { %2607 = vmatprep.subr.bf16.mxu1 %v2860_v5  ;;  %1924 = vmatmul.mubr.bf16.gmra.mxu1 %v2859_v49 }
  0xdd   : > { %v386_v39 = vpop.permute.xlu1 %385  ;;  %1931 = vmatprep.mubr.bf16.mxu1 %v2861_v53  ;;  %v495_v53 = vunpack.c.h.bf16 %v3396_v55 }
  0xde   : > { %v407_v41 = vadd.f32 %v386_v39, %v367_v34 }
  0xdf   : > { %2725 = vset.pattern.permute.xlu1 %v3010_v15  ;;  %v3378_v43 = vpop.permute.xlu0 %340  ;;  %2608 = vmatpush3.bf16.msra.mxu1 %v2860_v5 }
  0xe0   : > { %v415_v45 = vmax.f32 %v351_v40, %v407_v41  ;;  %585 = vperm.xlu1 %2725, %v3220_v9   ;;  %v2863_v9 = vld [vmem:[%s3819_s2 + $0x18] sm:$0xff]  }
  0xe1   : > { %2609 = vmatprep.subr.bf16.mxu1 %v2863_v9  ;;  %2598 = vmatmul.mubr.bf16.gmra.mxu0 %v2305_v16  ;;  %v3453_v40 = vld [vmem:[%s3168_s23 + $0xc] ss:$204 sps:$4 sm:$0xff]  }
  0xe2   : > { %v438_v50 = vpop.permute.xlu1 %437  ;;  %v492_v49 = vunpack.c.l.bf16 %v3453_v40 }
  0xe3   : > { %v468_v51 = vadd.f32 %v438_v50, %v428_v44  ;;  %2610 = vmatpush3.bf16.msra.mxu1 %v2863_v9 }
  0xe4   : > { %2726 = vset.pattern.permute.xlu1 %v3012_v33  ;;  %v382_v54 = vpop.permute.xlu0 %381  ;;  %2611 = vmatprep.subr.bf16.mxu1 %v2867_v17 }
  0xe5   : > { %v3401_v58 = vmax.f32 %v412_v13, %v468_v51  ;;  %v406_v59 = vadd.f32 %v382_v54, %v366_v48  ;;  %821 = vperm.xlu1 %2726, %v2871_v60   ;;  %1932 = vmatmul.mubr.bf16.gmra.mxu1 %v2864_v11  ;;  %v3466_v48 = vld [vmem:[%s3168_s23 + $0x58] sm:$0xff]   ;;  %v2875_v11 = vld [vmem:[%s3184_s7 + $0x20] sm:$0xff] }
  0xe6   : > { %v446_v2 = vpop.permute.xlu1 %445  ;;  %v558_v50 = vunpack.c.l.bf16 %v3466_v48  ;;  %v3476_v51 = vld [vmem:[%s3168_s23 + $0x7c] sm:$0xff]  }
  0xe7   : > { %v414_v0 = vmax.f32 %v350_v47, %v406_v59  ;;  %v470_v13 = vadd.f32 %v446_v2, %v430_v52  ;;  %2612 = vmatpush3.bf16.msra.mxu1 %v2867_v17  ;;  %v559_v2 = vunpack.c.l.bf16 %v3476_v51 }
  0xe8   : > { %v3424_v18 = vpop.permute.xlu0 %393  ;;  %2613 = vmatprep.subr.bf16.mxu1 %v2868_v28 }
  0xe9   : > { %v478_v19 = vmax.f32 %v414_v0, %v470_v13  ;;  %2728 = vset.pattern.permute.xlu1 %v3010_v15  ;;  %v3441_v15 = vld [vmem:[%s3184_s7 + $0x38] sm:$0xff] }
  0xea   : > { %589 = vperm.xlu1 %2728, %v3429_v25   ;;  %v450_v26 = vpop.permute.xlu1 %449 }
  0xeb   : > { %v471_v27 = vadd.f32 %v450_v26, %v431_v14  ;;  %2614 = vmatpush3.bf16.msra.mxu1 %v2868_v28 }
  0xec   : > { %v3435_v29 = vpop.permute.xlu0 %401  ;;  %2615 = vmatprep.subr.bf16.mxu1 %v2869_v36 }
  0xed   : > { %v479_v3 = vmax.f32 %v415_v45, %v471_v27 }
  0xee   : > { %593 = vperm.xlu1 %2728, %v3441_v15  }
  0xef   : > { %v506_v34 = vpop.permute.xlu1 %505  ;;  %2616 = vmatpush3.bf16.msra.mxu1 %v2869_v36 }
  0xf0   : > { %v3455_v41 = vadd.f32 %v506_v34, %v493_v37  ;;  %v424_v34 = vld [vmem:[%s3168_s23 + $0x98] sm:$0xff]  }
  0xf1   : > { %v442_v38 = vpop.permute.xlu0 %441 }
  0xf2   : > { %v469_v39 = vadd.f32 %v442_v38, %v429_v32  ;;  %2729 = vset.pattern.permute.xlu1 %v3012_v33 }
  0xf3   : > { %833 = vperm.xlu1 %2729, %v3362_v35   ;;  %v510_v57 = vpop.permute.xlu1 %509 }
  0xf4   : > { %v3460_v42 = vmax.f32 %v413_v24, %v469_v39  ;;  %v534_v44 = vadd.f32 %v510_v57, %v494_v6  ;;  %v556_v24 = vunpack.c.l.bf16 %v3463_v46  ;;  %v552_v57 = vld [vmem:[%s3168_s23 + $0xa0] sm:$0xff]  }
  0xf5   : > { %v454_v5 = vpop.permute.xlu0 %453 }
  0xf6   : > { %v542_v45 = vmax.f32 %v478_v19, %v534_v44  ;;  %v541_v35 = vmax.f32 %v3460_v42, %v3455_v41 }
  0xf7   : > { %2731 = vset.pattern.permute.xlu1 %v3011_v31  ;;  %v361_v31 = vld [vmem:[%s3168_s23 + $0xb4] sm:$0xff]  }
  0xf8   : > { %649 = vperm.xlu1 %2731, %v2874_v20   ;;  %v566_v22 = vpop.permute.xlu1 %565  ;;  %v369_v55 = vunpack.c.h.bf16 %v361_v31  ;;  %v305_v27 = vunpack.c.l.bf16 %v361_v31 }
  0xf9   : > { %v596_v54 = vadd.f32 %v566_v22, %v556_v24  ;;  %v560_v24 = vunpack.c.l.bf16 %v552_v57 }
  0xfa   : > { %v502_v47 = vpop.permute.xlu0 %501  ;;  %v3493_v32 = vadd.f32 %v3424_v18, %v369_v55  ;;  %v496_v18 = vunpack.c.h.bf16 %v424_v34  ;;  %v362_v55 = vld [vmem:[%s3168_s23 + $0xdc] sm:$0xff]  }
  0xfb   : > { %v532_v52 = vadd.f32 %v502_v47, %v492_v49 }
  0xfc   : > { %653 = vperm.xlu1 %2731, %v3429_v25   ;;  %v574_v9 = vpop.permute.xlu1 %573 }
  0xfd   : > { %v540_v59 = vmax.f32 %v3401_v58, %v532_v52  ;;  %v598_v60 = vadd.f32 %v574_v9, %v558_v50  ;;  %v296_v58 = vld [vmem:[%s3168_s23 + $0x90] sm:$0xff]  }
  0xfe   : > { %v514_v1 = vpop.permute.xlu0 %513  ;;  %v304_v36 = vunpack.c.l.bf16 %v296_v58  ;;  %v368_v38 = vunpack.c.h.bf16 %v296_v58 }
  0xff   : > { %v3483_v0 = vmax.f32 %v542_v45, %v598_v60  ;;  %v535_v13 = vadd.f32 %v514_v1, %v495_v53  ;;  %v3485_v14 = vmax.f32 %v540_v59, %v596_v54  ;;  %v363_v54 = vld [vmem:[%s3168_s23 + $0xfc] sm:$0xff]  }
 0x100   : > { %2733 = vset.pattern.permute.xlu1 %v3013_v56  ;;  %v578_v16 = vpop.permute.xlu1 %577  ;;  %v352_v44 = vadd.f32 %v3365_v4, %v304_v36 }
 0x101   : > { %v543_v17 = vmax.f32 %v479_v3, %v535_v13  ;;  %v599_v19 = vadd.f32 %v578_v16, %v559_v2  ;;  %709 = vperm.xlu1 %2733, %v2875_v11   ;;  %v432_v3 = vunpack.c.l.bf16 %v424_v34  ;;  %v307_v13 = vunpack.c.l.bf16 %v363_v54 }
 0x102   : > { %v518_v26 = vpop.permute.xlu0 %517  ;;  %v306_v16 = vunpack.c.h.bf16 %v3453_v40 }
 0x103   : > { %v3490_v28 = vmax.f32 %v543_v17, %v599_v19  ;;  %v472_v49 = vadd.f32 %v454_v5, %v432_v3  ;;  %v536_v47 = vadd.f32 %v518_v26, %v496_v18  ;;  %v371_v5 = vunpack.c.h.bf16 %v363_v54  ;;  %v425_v3 = vld [vmem:[%s3168_s23 + $0xbc] sm:$0xff]  }
 0x105   : > { %717 = vperm.xlu1 %2733, %v3429_v25   ;;  %v336_v37 = vpop.permute.xlu1 %335 }
 0x106   : > { %v3497_v56 = vadd.f32 %v336_v37, %v305_v27  ;;  %v370_v27 = vunpack.c.l.bf16 %v362_v55 }
 0x107   : > { %v3499_v6 = vpop.permute.xlu0 %569 }
 0x108   : > { %v417_v39 = vmax.f32 %v3497_v56, %v3493_v32 }
 0x109   : > { %721 = vperm.xlu1 %2733, %v3441_v15  }
 0x10a   : > { %v390_v45 = vpop.permute.xlu1 %389 }
 0x10b   : > { %v408_v22 = vadd.f32 %v390_v45, %v368_v38  ;;  %v582_v50 = vpop.permute.xlu0 %581 }
 0x10c   : > { %v600_v9 = vadd.f32 %v582_v50, %v560_v24 }
 0x10d   : > { %v416_v52 = vmax.f32 %v352_v44, %v408_v22  ;;  %2735 = vset.pattern.permute.xlu1 %v3014_v21  ;;  %v624_v21 = vunpack.c.h.bf16 %v552_v57  ;;  %v433_v44 = vunpack.c.l.bf16 %v425_v3 }
 0x10e   : > { %777 = vperm.xlu1 %2735, %v2874_v20   ;;  %v411_v20 = vadd.f32 %v3435_v29, %v371_v5 }
 0x10f   : > { %v480_v53 = vmax.f32 %v416_v52, %v472_v49  ;;  %v3507_v31 = vpop.permute.xlu1 %629 }
 0x110   : > { %v3510_v4 = vpop.permute.xlu0 %825 }
 0x111   : > { %v544_v59 = vmax.f32 %v480_v53, %v536_v47  ;;  %v814_v47 = vunpack.c.l.bf16 %v3368_v8 }
 0x112   : > { %781 = vperm.xlu1 %2735, %v3429_v25  }
 0x113   : > { %v3513_v60 = vmax.f32 %v544_v59, %v600_v9  ;;  %v3515_v2 = vpop.permute.xlu1 %633  ;;  %v434_v59 = vunpack.c.h.bf16 %v362_v55 }
 0x114   : > { %v830_v1 = vpop.permute.xlu0 %829 }
 0x116   : > { %2736 = vset.pattern.permute.xlu1 %v3012_v33  ;;  %v354_v33 = vadd.f32 %v3378_v43, %v306_v16  ;;  %v622_v43 = vunpack.c.h.bf16 %v3466_v48  ;;  %v854_v48 = vadd.f32 %v830_v1, %v814_v47  ;;  %v497_v1 = vunpack.c.h.bf16 %v425_v3  ;;  %v676_v47 = vld [vmem:[%s3168_s23 + $0x18] sm:$0xff]  }
 0x117   : > { %837 = vperm.xlu1 %2736, %v2875_v11   ;;  %v557_v3 = vunpack.c.h.bf16 %v3438_v30 }
 0x118   : > { %v346_v17 = vpop.permute.xlu1 %345 }
 0x119   : > { %v355_v19 = vadd.f32 %v346_v17, %v307_v13  ;;  %v646_v58 = vpop.permute.xlu0 %645  ;;  %v3542_v13 = vld [vmem:[%s3168_s23 + $0x104] sm:$0xff]  }
 0x11a   : > { %v3521_v26 = vadd.f32 %v646_v58, %v624_v21 }
 0x11b   : > { %v419_v32 = vmax.f32 %v355_v19, %v411_v20  ;;  %845 = vperm.xlu1 %2736, %v3429_v25   ;;  %v678_v25 = vld [vmem:[%s3168_s23 + $0x60] sm:$0xff]   ;;  %v435_v19 = vunpack.c.l.bf16 %v3542_v13 }
 0x11c   : > { %v686_v49 = vunpack.c.l.bf16 %v678_v25  ;;  %v750_v9 = vunpack.c.h.bf16 %v678_v25 }
 0x11d   : > { %v398_v11 = vpop.permute.xlu1 %397  ;;  %v3527_v34 = vpop.permute.xlu0 %657 }
 0x11e   : > { %v410_v40 = vadd.f32 %v398_v11, %v370_v27 }
 0x11f   : > { %849 = vperm.xlu1 %2736, %v3441_v15  }
 0x120   : > { %v418_v36 = vmax.f32 %v354_v33, %v410_v40 }
 0x122   : > { %v638_v37 = vpop.permute.xlu1 %637  ;;  %v698_v56 = vpop.permute.xlu0 %697 }
 0x123   : > { %v662_v24 = vadd.f32 %v638_v37, %v622_v43 }
 0x125   : > { %v670_v54 = vmax.f32 %v3483_v0, %v662_v24  ;;  %v741_v24 = vld [vmem:[%s3168_s23 + $0x40] sm:$0xf] }
 0x126   : > { %v3531_v38 = vpop.permute.xlu1 %641  ;;  %v702_v57 = vpop.permute.xlu0 %701 }
 0x127   : > { %v726_v52 = vadd.f32 %v702_v57, %v686_v49  ;;  %v3558_v57 = vld [vmem:[%s3168_s23 + $0xe4] sm:$0xff]  }
 0x129   : > { %v734_v21 = vmax.f32 %v670_v54, %v726_v52  ;;  %v597_v52 = vadd.f32 %v3499_v6, %v557_v3  ;;  %v813_v6 = vunpack.c.l.bf16 %v3342_v23  ;;  %v499_v3 = vunpack.c.h.bf16 %v3542_v13 }
 0x12a   : > { %v3535_v18 = vpop.permute.xlu0 %713 }
 0x12b   : > { %v458_v45 = vpop.permute.xlu1 %457  ;;  %v853_v23 = vadd.f32 %v3510_v4, %v813_v6 }
 0x12c   : > { %v473_v22 = vadd.f32 %v458_v45, %v433_v44 }
 0x12e   : > { %v3537_v50 = vmax.f32 %v417_v39, %v473_v22 }
 0x12f   : > { %v762_v15 = vpop.permute.xlu0 %761 }
 0x130   : > { %v694_v53 = vpop.permute.xlu1 %693 }
 0x133   : > { %v766_v5 = vpop.permute.xlu0 %765 }
 0x134   : > { %v790_v20 = vadd.f32 %v766_v5, %v750_v9  ;;  %v620_v9 = vunpack.c.h.bf16 %v3463_v46 }
 0x135   : > { %v462_v16 = vpop.permute.xlu1 %461 }
 0x136   : > { %v798_v17 = vmax.f32 %v734_v21, %v790_v20  ;;  %v474_v39 = vadd.f32 %v462_v16, %v434_v59  ;;  %v684_v21 = vunpack.c.l.bf16 %v676_v47  ;;  %v605_v20 = vmax.f32 %v541_v35, %v597_v52 }
 0x137   : > { %v660_v30 = vadd.f32 %v3507_v31, %v620_v9  ;;  %v812_v31 = vunpack.c.l.bf16 %v3345_v7 }
 0x138   : > { %v3545_v8 = vmax.f32 %v798_v17, %v854_v48  ;;  %v3547_v58 = vmax.f32 %v418_v36, %v474_v39  ;;  %v498_v36 = vunpack.c.l.bf16 %v3558_v57  ;;  %v749_v48 = vunpack.c.l.bf16 %v741_v24  ;;  %v3576_v39 = vpop.f32.mrf.mxu0  ;;  %v3597_v24 = vld [vmem:[%s3168_s23 + $0xd0] ss:$60 sps:$4 sm:$0xff]  }
 0x139   : > { %v466_v27 = vpop.permute.xlu1 %465  ;;  %v748_v17 = vunpack.c.h.bf16 %v676_v47  ;;  %v668_v41 = vmax.f32 %v3485_v14, %v660_v30  ;;  %v3593_v14 = vld [vmem:[%s3168_s23 + $0xcc] ss:$68 sps:$4 sm:$0xff]   ;;  %v563_v13 = vunpack.c.h.bf16 %v3597_v24 }
 0x13a   : > { %v475_v0 = vadd.f32 %v466_v27, %v435_v19  ;;  %v789_v46 = vadd.f32 %v762_v15, %v749_v48  ;;  %v724_v27 = vadd.f32 %v694_v53, %v684_v21 }
 0x13c   : > { %v3549_v55 = vmax.f32 %v419_v32, %v475_v0  ;;  %v613_v32 = vld [vmem:[%s3168_s23 + $0x38] sm:$0xff]   ;;  %v732_v15 = vmax.f32 %v668_v41, %v724_v27 }
 0x13d   : > { %v621_v22 = vunpack.c.l.bf16 %v613_v32  ;;  %v685_v54 = vunpack.c.h.bf16 %v613_v32  ;;  %v679_v32 = vld [vmem:[%s3168_s23 + $0x84] sm:$0xff]  }
 0x13e   : > { %v3551_v33 = vpop.permute.xlu1 %705  ;;  %v687_v4 = vunpack.c.l.bf16 %v679_v32 }
 0x13f   : > { %v661_v5 = vadd.f32 %v3515_v2, %v621_v22  ;;  %v725_v16 = vadd.f32 %v698_v56, %v685_v54  ;;  %v3581_v2 = vpop.f32.mrf.mxu0 }
 0x140   : > { %v727_v30 = vadd.f32 %v3551_v33, %v687_v4  ;;  %v553_v4 = vld [vmem:[%s3168_s23 + $0xc4] sm:$0xff]  }
 0x141   : > { %v669_v19 = vmax.f32 %v605_v20, %v661_v5  ;;  %v3585_v56 = vpop.f32.mrf.mxu0  ;;  %v627_v5 = vunpack.c.h.bf16 %v3593_v14 }
 0x143   : > { %v522_v11 = vpop.permute.xlu1 %521  ;;  %v733_v42 = vmax.f32 %v669_v19, %v725_v16  ;;  %v3588_v53 = vpop.f32.mrf.mxu0  ;;  %v3614_v6 = vadd.f32 %v3527_v34, %v627_v5 }
 0x144   : > { %v3553_v40 = vadd.f32 %v522_v11, %v497_v1 }
 0x145   : > { %v797_v1 = vmax.f32 %v733_v42, %v789_v46  ;;  %v3599_v47 = vpop.f32.mrf.mxu0 }
 0x146   : > { %v545_v37 = vmax.f32 %v3537_v50, %v3553_v40 }
 0x147   : > { %v861_v22 = vmax.f32 %v797_v1, %v853_v23  ;;  %v3603_v54 = vpop.f32.mrf.mxu0 }
 0x148   : > { %v758_v44 = vpop.permute.xlu1 %757 }
 0x149   : > { %v788_v35 = vadd.f32 %v758_v44, %v748_v17  ;;  %v623_v44 = vunpack.c.h.bf16 %v3476_v51  ;;  %v751_v51 = vunpack.c.h.bf16 %v679_v32  ;;  %v3608_v20 = vpop.f32.mrf.mxu0 }
 0x14b   : > { %v663_v21 = vadd.f32 %v3531_v38, %v623_v44  ;;  %v3611_v17 = vpop.f32.mrf.mxu0  ;;  %v815_v38 = vunpack.c.l.bf16 %v3357_v10 }
 0x14d   : > { %v526_v25 = vpop.permute.xlu1 %525  ;;  %v2421_v42 = vpop.f32.mrf.mxu0 }
 0x14e   : > { %v3561_v43 = vadd.f32 %v526_v25, %v498_v36  ;;  %v796_v36 = vmax.f32 %v732_v15, %v788_v35 }
 0x14f   : > { %v2422_v23 = vpop.f32.mrf.mxu0 }
 0x150   : > { %v2423_v15 = vadd.f32 %v2422_v23, %v2421_v42 }
 0x151   : > { %v530_v49 = vpop.permute.xlu1 %529 }
 0x152   : > { %v539_v48 = vadd.f32 %v530_v49, %v499_v3  ;;  %v671_v49 = vmax.f32 %v3490_v28, %v663_v21 }
 0x154   : > { %v547_v19 = vmax.f32 %v3549_v55, %v539_v48  ;;  %v735_v35 = vmax.f32 %v671_v49, %v727_v30  ;;  %v2424_v55 = vpop.f32.mrf.mxu0  ;;  %v774_v30 = vpop.permute.xlu0 %773 }
 0x156   : > { %v770_v59 = vpop.permute.xlu1 %769 }
 0x157   : > { %v791_v27 = vadd.f32 %v770_v59, %v751_v51 }
 0x158   : > { %v3644_v42 = vpop.permute.xlu0 %785 }
 0x159   : > { %v799_v1 = vmax.f32 %v735_v35, %v791_v27 }
 0x15b   : > { %v3579_v0 = vpop.permute.xlu1 %585 }
 0x160   : > { %v822_v11 = vpop.permute.xlu1 %821 }
 0x161   : > { %v852_v25 = vadd.f32 %v822_v11, %v812_v31 }
 0x163   : > { %v860_v7 = vmax.f32 %v796_v36, %v852_v25  ;;  %v2425_v36 = vpop.f32.mrf.mxu0  ;;  %v3624_v25 = vpop.f32.mrf.mxu1 }
 0x164   : > { %v2426_v10 = vadd.f32 %v2425_v36, %v2424_v55 }
 0x165   : > { %v3601_v52 = vpop.permute.xlu1 %589  ;;  %v868_v9 = vpack.c.bf16 %v861_v22, %v860_v7  ;;  %v3626_v32 = vpop.f32.mrf.mxu1 }
 0x166   : > { %v2427_v3 = vpop.f32.mrf.mxu0 }
 0x167   : > { %2617 = vmatprep.mubr.bf16.mxu1 %v868_v9  ;;  %v3628_v22 = vpop.f32.mrf.mxu1 }
 0x168   : > { %v2428_v7 = vpop.f32.mrf.mxu0 }
 0x169   : > { %v594_v16 = vpop.permute.xlu1 %593  ;;  %v3631_v9 = vadd.f32 %v2428_v7, %v2427_v3  ;;  %v3633_v5 = vpop.f32.mrf.mxu1 }
 0x16a   : > { %v603_v46 = vadd.f32 %v594_v16, %v563_v13  ;;  %3838 = vst [vmem:[#allocation11_spill] sm:$0xff] %v3633_v5  ;;  %v2430_v48 = vpop.f32.mrf.mxu0  ;;  %v561_v13 = vunpack.c.l.bf16 %v553_v4 }
 0x16c   : > { %v3619_v41 = vmax.f32 %v547_v19, %v603_v46  ;;  %v2431_v51 = vpop.f32.mrf.mxu0  ;;  %v625_v46 = vunpack.c.h.bf16 %v553_v4  ;;  %v601_v27 = vadd.f32 %v3579_v0, %v561_v13  ;;  %v618_v4 = vld [vmem:[%s3168_s23 + $0xec] sm:$0xff]  }
 0x16d   : > { %v3637_v16 = vadd.f32 %v2431_v51, %v2430_v48  ;;  %v817_v48 = vunpack.c.l.bf16 %v3408_v62  ;;  %v562_v51 = vunpack.c.h.bf16 %v3558_v57  ;;  %v626_v40 = vunpack.c.l.bf16 %v618_v4 }
 0x16e   : > { %v834_v31 = vpop.permute.xlu1 %833  ;;  %v609_v55 = vmax.f32 %v545_v37, %v601_v27  ;;  %v690_v29 = vunpack.c.h.bf16 %v618_v4 }
 0x16f   : > { %v855_v34 = vadd.f32 %v834_v31, %v815_v38  ;;  %v689_v31 = vunpack.c.l.bf16 %v3593_v14  ;;  %v602_v62 = vadd.f32 %v3601_v52, %v562_v51  ;;  %v816_v52 = vunpack.c.l.bf16 %v3405_v61 }
 0x170   : > { %v818_v51 = vunpack.c.l.bf16 %v3413_v12 }
 0x171   : > { %v863_v11 = vmax.f32 %v799_v1, %v855_v34  ;;  %v680_v1 = vld [vmem:[%s3168_s23 + $0xa8] sm:$0xff]   ;;  %v729_v0 = vadd.f32 %v3535_v18, %v689_v31 }
 0x172   : > { %v688_v36 = vunpack.c.l.bf16 %v680_v1  ;;  %v752_v37 = vunpack.c.h.bf16 %v680_v1  ;;  %v3839_v1 = vmax.f32 %v3513_v60, %v3521_v26 }
 0x173   : > { %v869_v28 = vpack.c.bf16 %v863_v11, %v3545_v8  ;;  %v650_v59 = vpop.permute.xlu1 %649  ;;  %v3635_v8 = vpop.f32.mrf.mxu1 }
 0x174   : > { %v665_v23 = vadd.f32 %v650_v59, %v625_v46  ;;  %v842_v59 = vpop.permute.xlu0 %841 }
 0x175   : > { %2618 = vmatmul.mubr.bf16.vlgmr.msra.gmra.mxu1 %v869_v28  ;;  %v3639_v19 = vpop.f32.mrf.mxu1  ;;  %v753_v28 = vunpack.c.l.bf16 %v3597_v24  ;;  %v857_v18 = vadd.f32 %v842_v59, %v817_v48 }
 0x176   : > { %v673_v7 = vmax.f32 %v609_v55, %v665_v23  ;;  %v683_v55 = vld [vmem:[%s3168_s23 + $0x114] sm:$0xff]  }
 0x177   : > { %v654_v44 = vpop.permute.xlu1 %653  ;;  %v3641_v49 = vpop.f32.mrf.mxu1  ;;  %v755_v26 = vunpack.c.h.bf16 %v683_v55 }
 0x178   : > { %v737_v27 = vmax.f32 %v673_v7, %v729_v0  ;;  %v691_v7 = vunpack.c.l.bf16 %v683_v55 }
 0x179   : > { %v3646_v35 = vpop.f32.mrf.mxu1 }
 0x17b   : > { %v2461_v34 = vpop.f32.mrf.mxu1 }
 0x17c   : > { %v710_v21 = vpop.permute.xlu1 %709 }
 0x17d   : > { %v2462_v3 = vpop.f32.mrf.mxu1  ;;  %v728_v24 = vadd.f32 %v710_v21, %v688_v36  ;;  %v792_v36 = vadd.f32 %v774_v30, %v752_v37 }
 0x17e   : > { %v2463_v14 = vadd.f32 %v2462_v3, %v2461_v34  ;;  %v746_v3 = vld [vmem:[%s3168_s23 + $0xf4] sm:$0xf] }
 0x17f   : > { %v2464_v13 = vpop.f32.mrf.mxu1  ;;  %v736_v21 = vmax.f32 %v3839_v1, %v728_v24  ;;  %v754_v48 = vunpack.c.l.bf16 %v746_v3  ;;  %v2489_v3 = vpop.f32.mrf.mxu0 }
 0x180   : > { %v718_v38 = vpop.permute.xlu1 %717  ;;  %v3658_v50 = vadd.f32 %v2463_v14, %v2423_v15  ;;  %v666_v15 = vadd.f32 %v654_v44, %v626_v40 }
 0x181   : > { %v2465_v31 = vpop.f32.mrf.mxu1  ;;  %v800_v60 = vmax.f32 %v736_v21, %v792_v36 }
 0x182   : > { %v2466_v23 = vadd.f32 %v2465_v31, %v2464_v13 }
 0x184   : > { %v722_v11 = vpop.permute.xlu1 %721  ;;  %v2467_v45 = vpop.f32.mrf.mxu1  ;;  %v3663_v57 = vadd.f32 %v2466_v23, %v2426_v10  ;;  %v730_v10 = vadd.f32 %v718_v38, %v690_v29  ;;  %v795_v29 = vadd.f32 %v3644_v42, %v755_v26  ;;  %v3841_v38 = vmax.f32 %v3619_v41, %v3614_v6 }
 0x185   : > { %v731_v37 = vadd.f32 %v722_v11, %v691_v7  ;;  %v2490_v42 = vpop.f32.mrf.mxu0 }
 0x186   : > { %v2468_v0 = vpop.f32.mrf.mxu1 }
 0x187   : > { %v2469_v14 = vadd.f32 %v2468_v0, %v2467_v45 }
 0x188   : > { %v2470_v59 = vpop.f32.mrf.mxu1 }
 0x189   : > { %v778_v46 = vpop.permute.xlu1 %777  ;;  %v3673_v44 = vadd.f32 %v2469_v14, %v3631_v9  ;;  %v819_v9 = vunpack.c.l.bf16 %v3416_v63 }
 0x18a   : > { %v793_v33 = vadd.f32 %v778_v46, %v753_v28  ;;  %v2471_v40 = vpop.f32.mrf.mxu1 }
 0x18b   : > { %v2472_v45 = vadd.f32 %v2471_v40, %v2470_v59 }
 0x18c   : > { %v801_v34 = vmax.f32 %v737_v27, %v793_v33  ;;  %v3840_v33 = vmax.f32 %v3547_v58, %v3561_v43  ;;  %v2529_v1 = vpop.f32.mrf.mxu1 }
 0x18d   : > { %v782_v5 = vpop.permute.xlu1 %781  ;;  %v3677_v58 = vadd.f32 %v2472_v45, %v3637_v16  ;;  %v2457_v45 = vadd.f32 %v3639_v19, %v3635_v8  ;;  %v2414_v8 = vadd.f32 %v3588_v53, %v3585_v56 }
 0x18e   : > { %v865_v28 = vmax.f32 %v801_v34, %v857_v18  ;;  %v610_v4 = vmax.f32 %v3840_v33, %v602_v62  ;;  %v794_v46 = vadd.f32 %v782_v5, %v754_v48  ;;  %v739_v18 = vmax.f32 %v3841_v38, %v731_v37  ;;  %v2530_v21 = vpop.f32.mrf.mxu1 }
 0x190   : > { %v674_v13 = vmax.f32 %v610_v4, %v666_v15  ;;  %v803_v62 = vmax.f32 %v739_v18, %v795_v29  ;;  %v2492_v15 = vpop.f32.mrf.mxu0  ;;  %v2532_v6 = vpop.f32.mrf.mxu1  ;;  %v2451_v29 = vadd.f32 %v3626_v32, %v3624_v25 }
 0x192   : > { %v838_v30 = vpop.permute.xlu1 %837  ;;  %v738_v24 = vmax.f32 %v674_v13, %v730_v10  ;;  %v2493_v63 = vpop.f32.mrf.mxu0 }
 0x193   : > { %v856_v61 = vadd.f32 %v838_v30, %v816_v52  ;;  %v2533_v0 = vpop.f32.mrf.mxu1 }
 0x194   : > { %v802_v12 = vmax.f32 %v738_v24, %v794_v46  ;;  %v2495_v36 = vpop.f32.mrf.mxu0 }
 0x195   : > { %v864_v27 = vmax.f32 %v800_v60, %v856_v61  ;;  %v2417_v61 = vadd.f32 %v3603_v54, %v3599_v47  ;;  %v2460_v47 = vadd.f32 %v3646_v35, %v3641_v49  ;;  %v2531_v49 = vadd.f32 %v2530_v21, %v2529_v1 }
 0x196   : > { %v846_v43 = vpop.permute.xlu1 %845  ;;  %v2496_v41 = vpop.f32.mrf.mxu0 }
 0x197   : > { %v858_v31 = vadd.f32 %v846_v43, %v818_v51  ;;  %v870_v11 = vpack.c.bf16 %v865_v28, %v864_v27  ;;  %v2535_v28 = vpop.f32.mrf.mxu1  ;;  %v2411_v27 = vadd.f32 %v3581_v2, %v3576_v39  ;;  %v1788_v38 = vadd.f32 %v2457_v45, %v2417_v61  ;;  %v3842_v39 = vld [vmem:[#allocation11_spill] sm:$0xff] }
 0x198   : > { %v2498_v7 = vpop.f32.mrf.mxu0  ;;  %v2497_v54 = vadd.f32 %v2496_v41, %v2495_v36  ;;  %v2454_v2 = vadd.f32 %v3842_v39, %v3628_v22  ;;  %v2534_v36 = vadd.f32 %v2533_v0, %v2532_v6 }
 0x199   : > { %v866_v5 = vmax.f32 %v802_v12, %v858_v31  ;;  %2621 = vmatprep.mubr.bf16.mxu1 %v870_v11  ;;  %v2536_v52 = vpop.f32.mrf.mxu1  ;;  %v1780_v19 = vadd.f32 %v2451_v29, %v2411_v27  ;;  %v2491_v12 = vadd.f32 %v2490_v42, %v2489_v3 }
 0x19a   : > { %v850_v23 = vpop.permute.xlu1 %849  ;;  %v2499_v48 = vpop.f32.mrf.mxu0  ;;  %v1853_v31 = vadd.f32 %v2497_v54, %v1788_v38 }
 0x19b   : > { %v859_v55 = vadd.f32 %v850_v23, %v819_v9  ;;  %v2538_v33 = vpop.f32.mrf.mxu1  ;;  %v2420_v9 = vadd.f32 %v3611_v17, %v3608_v20  ;;  %v2500_v11 = vadd.f32 %v2499_v48, %v2498_v7  ;;  %v1783_v17 = vadd.f32 %v2454_v2, %v2414_v8  ;;  %v3729_v7 = vld [vmem:[%s3821_s4] ss:$0 sm:$0xff] }
 0x19c   : > { %v3684_v14 = vpop.f32.mrf.mxu0  ;;  %v1845_v23 = vadd.f32 %v2491_v12, %v1780_v19 }
 0x19d   : > { %v867_v34 = vmax.f32 %v803_v62, %v859_v55  ;;  %v2539_v59 = vpop.f32.mrf.mxu1  ;;  %v1791_v32 = vadd.f32 %v2460_v47, %v2420_v9  ;;  %v2494_v62 = vadd.f32 %v2493_v63, %v2492_v15 }
 0x19e   : > { %v3686_v4 = vpop.f32.mrf.mxu0  ;;  %v2540_v56 = vadd.f32 %v2539_v59, %v2538_v33  ;;  %v1910_v22 = vadd.f32 %v2531_v49, %v1845_v23 }
 0x19f   : > { %v871_v16 = vpack.c.bf16 %v867_v34, %v866_v5  ;;  %v3690_v13 = vpop.f32.mrf.mxu1  ;;  %v2537_v5 = vadd.f32 %v2536_v52, %v2535_v28  ;;  %v1856_v55 = vadd.f32 %v2500_v11, %v1791_v32  ;;  %v2503_v2 = vadd.f32 %v3686_v4, %v3684_v14 }
 0x1a0   : > { %v3688_v10 = vpop.f32.mrf.mxu0 }
 0x1a1   : > { %2622 = vmatmul.mubr.bf16.gmra.mxu1 %v871_v16  ;;  %v3694_v26 = vpop.f32.mrf.mxu1  ;;  %v1918_v34 = vadd.f32 %v2537_v5, %v1853_v31  ;;  %v1848_v16 = vadd.f32 %v2494_v62, %v1783_v17  ;;  %v1921_v42 = vadd.f32 %v2540_v56, %v1856_v55  ;;  %v1861_v11 = vadd.f32 %v2503_v2, %v3658_v50 }
 0x1a2   : > { %v3692_v60 = vpop.f32.mrf.mxu0  ;;  %v2543_v17 = vadd.f32 %v3694_v26, %v3690_v13 }
 0x1a3   : > { %v3698_v51 = vpop.f32.mrf.mxu1  ;;  %v1913_v1 = vadd.f32 %v2534_v36, %v1848_v16  ;;  %v2506_v5 = vadd.f32 %v3692_v60, %v3688_v10 }
 0x1a4   : > { %v3696_v30 = vpop.f32.mrf.mxu0 }
 0x1a5   : > { %v3702_v37 = vpop.f32.mrf.mxu1 }
 0x1a6   : > { %v3700_v40 = vpop.f32.mrf.mxu0 }
 0x1a7   : > { %v3710_v24 = vpop.f32.mrf.mxu1  ;;  %v2509_v39 = vadd.f32 %v3700_v40, %v3696_v30 }
 0x1a8   : > { %v3704_v46 = vpop.f32.mrf.mxu0 }
 0x1a9   : > { %v2548_v18 = vpop.f32.mrf.mxu1 }
 0x1aa   : > { %v3716_v43 = vpop.f32.mrf.mxu0  ;;  %v2549_v31 = vadd.f32 %v2548_v18, %v3710_v24 }
 0x1ab   : > { %v2550_v20 = vpop.f32.mrf.mxu1  ;;  %v2512_v32 = vadd.f32 %v3716_v43, %v3704_v46  ;;  %v2546_v46 = vadd.f32 %v3702_v37, %v3698_v51  ;;  %v1926_v43 = vadd.f32 %v2543_v17, %v1861_v11 }
 0x1ac   : > { %v2595_v25 = vpop.f32.mrf.mxu0 }
 0x1ad   : > { %v2551_v53 = vpop.f32.mrf.mxu1  ;;  %v1983_v41 = vadd.f32 %v2595_v25, %v1918_v34  ;;  %v1869_v25 = vadd.f32 %v2509_v39, %v3673_v44  ;;  %v1872_v40 = vadd.f32 %v2512_v32, %v3677_v58  ;;  %v1864_v44 = vadd.f32 %v2506_v5, %v3663_v57 }
 0x1ae   : > { %v1974_v35 = vpop.f32.mrf.mxu0  ;;  %v2552_v4 = vadd.f32 %v2551_v53, %v2550_v20 }
 0x1af   : > { %v1975_v15 = vadd.f32 %v1974_v35, %v1910_v22  ;;  %v1934_v14 = vadd.f32 %v2549_v31, %v1869_v25  ;;  %v1929_v60 = vadd.f32 %v2546_v46, %v1864_v44 }
 0x1b0   : > { %v2596_v3 = vpop.f32.mrf.mxu0  ;;  %v1937_v18 = vadd.f32 %v2552_v4, %v1872_v40 }
 0x1b1   : > { %v1986_v6 = vadd.f32 %v2596_v3, %v1921_v42 }
 0x1b2   : > { %v1977_v21 = vpop.f32.mrf.mxu0 }
 0x1b3   : > { %v1978_v33 = vadd.f32 %v1977_v21, %v1913_v1 }
 0x1b4   : > { %v2599_v12 = vpop.f32.mrf.mxu0 }
 0x1b5   : > { %v1999_v50 = vadd.f32 %v2599_v12, %v1934_v14 }
 0x1b6   : > { %v1990_v30 = vpop.f32.mrf.mxu0 }
 0x1b7   : > { %v1991_v10 = vadd.f32 %v1990_v30, %v1926_v43 }
 0x1b8   : > { %v2600_v24 = vpop.f32.mrf.mxu0 }
 0x1b9   : > { %v2002_v62 = vadd.f32 %v2600_v24, %v1937_v18 }
 0x1ba   : > { %v1993_v26 = vpop.f32.mrf.mxu0 }
 0x1bb   : > { %v1994_v51 = vadd.f32 %v1993_v26, %v1929_v60 }
 0x235   : > { %v2619_v61 = vpop.f32.mrf.mxu1 }
 0x236   : > { %v2096_v63 = vadd.f32 %v2619_v61, %v1983_v41 }
 0x237   : > { %v2087_v28 = vpop.f32.mrf.mxu1 }
 0x238   : > { %v2127_v48 = vadd.f32 %v3729_v7, %v2096_v63  ;;  %v2088_v52 = vadd.f32 %v2087_v28, %v1975_v15 }
 0x239   : > { %v2620_v0 = vpop.f32.mrf.mxu1 }
 0x23a   : > { %v2135_v59 = vmax.f32 %v2127_v48, 0.0  ;;  %v2125_v45 = vadd.f32 %v3729_v7, %v2088_v52  ;;  %v2099_v27 = vadd.f32 %v2620_v0, %v1986_v6 }
 0x23b   : > { %v2090_v29 = vpop.f32.mrf.mxu1 }
 0x23c   : > { %2143 = vst [vmem:[%s3734_s6 + $0x10] sm:$0xff] %v2135_v59  ;;  %v2133_v9 = vmax.f32 %v2125_v45, 0.0  ;;  %v2128_v38 = vadd.f32 %v3729_v7, %v2099_v27  ;;  %v2091_v47 = vadd.f32 %v2090_v29, %v1978_v33 }
 0x23e   : > { %2141 = vst [vmem:[%s3734_s6] sm:$0xff] %v2133_v9  ;;  %v2136_v54 = vmax.f32 %v2128_v38, 0.0  ;;  %v2126_v8 = vadd.f32 %v3729_v7, %v2091_v47 }
 0x240   : > { %2144 = vst [vmem:[%s3734_s6 + $0x18] sm:$0xff] %v2136_v54  ;;  %v2134_v19 = vmax.f32 %v2126_v8, 0.0 }
 0x242   : > { %2142 = vst [vmem:[%s3734_s6 + $0x8] sm:$0xff] %v2134_v19 }
 0x261   : > { %v2623_v23 = vpop.f32.mrf.mxu1 }
 0x262   : > { %v2112_v13 = vadd.f32 %v2623_v23, %v1999_v50 }
 0x263   : > { %v2103_v58 = vpop.f32.mrf.mxu1 }
 0x264   : > { %v2131_v20 = vadd.f32 %v3729_v7, %v2112_v13  ;;  %v2104_v57 = vadd.f32 %v2103_v58, %v1991_v10 }
 0x265   : > { %v2624_v49 = vpop.f32.mrf.mxu1 }
 0x266   : > { %v2139_v37 = vmax.f32 %v2131_v20, 0.0  ;;  %v2129_v35 = vadd.f32 %v3729_v7, %v2104_v57  ;;  %v2115_v55 = vadd.f32 %v2624_v49, %v2002_v62 }
 0x267   : > { %v2106_v34 = vpop.f32.mrf.mxu1 }
 0x268   : > { %2147 = vst [vmem:[%s3734_s6 + $0x30] sm:$0xff] %v2139_v37  ;;  %v2137_v56 = vmax.f32 %v2129_v35, 0.0  ;;  %v2132_v53 = vadd.f32 %v3729_v7, %v2115_v55  ;;  %v2107_v16 = vadd.f32 %v2106_v34, %v1994_v51 }
 0x26a   : > { %2145 = vst [vmem:[%s3734_s6 + $0x20] sm:$0xff] %v2137_v56  ;;  %v2140_v36 = vmax.f32 %v2132_v53, 0.0  ;;  %v2130_v22 = vadd.f32 %v3729_v7, %v2107_v16 }
 0x26c   : > { %2148 = vst [vmem:[%s3734_s6 + $0x38] sm:$0xff] %v2140_v36  ;;  %v2138_v3 = vmax.f32 %v2130_v22, 0.0 }
 0x26e   : > { %2146 = vst [vmem:[%s3734_s6 + $0x28] sm:$0xff] %v2138_v3 }
 0x26f   : > { %2943 = shalt.err (!%p2940_p5)
}
 0x270   : > { %s2944_s15 = scalar_lea.hbm %s3772_s26, 1024  ;;  %s2948_s7 = scalar_lea.hbm %s3822_s5, 2048 }
 0x271   : > { %p2945_p9 = scmp.ne.s32.totalorder %s3772_s26, %s2944_s15  ;;  %p2949_p6 = scmp.lt.s32.totalorder %s3772_s26, %s3822_s5 }
 0x272   : > { %p2950_p8 = scmp.lt.s32.totalorder %s2948_s7, %s2944_s15 }
 0x273   : > { %p2946_p1 = pnand %p2945_p9, %p3843_p7 }
 0x274   : > { %p2951_p3 = por %p2950_p8, %p2949_p6 }
 0x275   : > { %p2947_p4 = pneg %p2946_p1 }
 0x277   : > { %p2952_p11 = pnand %p2951_p3, %p2947_p4 }
 0x279   : > { %2955 = shalt.err (!%p2952_p11)
}
 0x27a   : > { %s3016_s10 = smov 128   ;;  %s3017_s12 = smov 8  }
 0x27b   : > { %2634 = dma.vmem_to_hbm [thread:$0]  (%p3843_p7), %s3765_s9, 1024, %s3772_s26, %s2150_s29, %s3016_s10, %s3016_s10, %s3017_s12  }
 0x27c PF: > { %s2178_s16 = sand.u32 1, %s2986_s18   ;;  %p3844_p12 = scmp.ne.s32.totalorder %s3828_s25, 0 }
 0x27d   : > { %p3845_p10 = scmp.ge.s32.totalorder %s2998_s21, 2  ;;  %s2179_s28 = scalar_lea.sflag [#allocation4], %s2178_s16 }
 0x27f   : > { %p2645_p2 = pnand %p3845_p10, %p3844_p12 }
 0x281   : > { %p2646_p13 = pneg %p2645_p2 }
 0x283   : > { %2981 = dma.done.wait (%p2646_p13), %s2179_s28, 1024  }
 0x284   : > { %2983 = vsyncadd (%p2646_p13), %s2179_s28, 4294966272  ;;  %p19_p0 = scmp.ge.s32.totalorder %s3102_s30, 4   ;;  %s3846_s18 = smov %s2990_s19 }
 0x285   : > { %s3847_s19 = smov %s2994_s20  ;;  %s3848_s20 = smov %s3119_s13 }
 0x286   : > { %s3849_s21 = smov %s3102_s30  ;;  %21 = sbr.rel (!%p19_p0) target bundleno = 6 (0x6), region = 92 }
 0x28b   :  { %2184 = vsyncpa [#allocation3], 1 }
 0x28c   :  { %2186 = vsyncpa [#allocation3 + $0x1], 1 }
 0x28d   :  { %2187 = vsyncpa [#allocation6], 1 }
 0x28e   :  { %2188 = vsyncpa [#allocation4], 1 }
 0x28f   :  { %2190 = vsyncpa [#allocation4 + $0x1], 1 }

</bundles_post_ra>
